<compile_context>
chip_gen: v7x
topology: tpu7x:2x2x1
jax: 0.10.0
libtpu: 0.0.40
codegen_flags: <defaults>
</compile_context>

<pallas_src>
import functools

import jax
import jax.numpy as jnp
from jax.experimental import pallas as pl
from jax.experimental.pallas import tpu as pltpu


# ----------------------------------------------------------------------------
# Relative-position-bias helpers (wrapper-side, plain JAX, tiny)
# ----------------------------------------------------------------------------
def _relative_position_index(window_size):
    wh, ww = window_size
    coords = jnp.stack(
        jnp.meshgrid(jnp.arange(wh), jnp.arange(ww), indexing="ij"))   # (2,wh,ww)
    coords_flat = coords.reshape(2, -1)                                # (2, N)
    rel = coords_flat[:, :, None] - coords_flat[:, None, :]            # (2, N, N)
    rel = jnp.transpose(rel, (1, 2, 0))                                # (N, N, 2)
    rel = rel + jnp.array([wh - 1, ww - 1], dtype=rel.dtype)
    return rel[..., 0] * (2 * ww - 1) + rel[..., 1]                    # (N, N)


def _dense_relative_position_bias(table, window_size):
    idx = _relative_position_index(window_size)                        # (N, N)
    n = idx.shape[0]
    bias = table[idx.reshape(-1)].reshape(n, n, -1)                    # (N,N,H)
    return jnp.transpose(bias, (2, 0, 1))                              # (H,N,N)


def _round_up(v, m):
    return ((v + m - 1) // m) * m


# ----------------------------------------------------------------------------
# Pallas kernel: a block of `bw` windows per grid step
# ----------------------------------------------------------------------------
def _window_attention_kernel(x_ref, wqkv_ref, bqkv_ref, rpb_ref, wproj_ref,
                             bproj_ref, out_ref, ctx_ref, *, num_heads,
                             head_dim):
    bw, n, cp = x_ref.shape
    d = head_dim
    c = num_heads * head_dim          # meaningful (unpadded) channels

    # Keep channel-padding columns of the ctx scratch zeroed so the (zero)
    # padded rows of wproj never multiply uninitialized VMEM.  Runs on every
    # grid step (megacore-safe); skipped entirely when there is no padding.
    if cp > c:
        ctx_ref[:, :, c:] = jnp.zeros((bw, n, cp - c), jnp.bfloat16)

    # Fused qkv projection: one bf16 MXU matmul over bw*N rows, f32 accumulate.
    # (q columns / bias were pre-scaled by head_dim**-0.5 in the wrapper.)
    x = x_ref[...].reshape(bw * n, cp)                                  # bf16
    qkv = jnp.dot(x, wqkv_ref[...], preferred_element_type=jnp.float32)
    qkv = (qkv + bqkv_ref[...]).astype(jnp.bfloat16)
    qkv = qkv.reshape(bw, n, 3 * cp)                # lane-aligned q | k | v

    for h in range(num_heads):        # static unroll; live range = one head
        lo = h * d
        q_h = qkv[:, :, lo:lo + d]                                      # (bw,n,d)
        k_h = qkv[:, :, cp + lo:cp + lo + d]
        v_h = qkv[:, :, 2 * cp + lo:2 * cp + lo + d]

        attn = jnp.einsum("bnd,bmd->bnm", q_h, k_h,
                          preferred_element_type=jnp.float32)           # f32
        attn = attn + rpb_ref[h][None, :, :]                            # rel-pos

        # softmax over keys in f32; divide goes to the EUP (approx reciprocal)
        attn = attn - jnp.max(attn, axis=-1, keepdims=True)
        attn = jnp.exp(attn)
        attn = attn * pl.reciprocal(jnp.sum(attn, axis=-1, keepdims=True),
                                    approx=True)

        ctx_h = jnp.einsum("bnm,bmd->bnd", attn.astype(jnp.bfloat16), v_h,
                           preferred_element_type=jnp.float32)
        ctx_ref[:, :, lo:lo + d] = ctx_h.astype(jnp.bfloat16)           # merge

    # Output projection: one bf16 MXU matmul over bw*N rows (K = cp).
    ctx = ctx_ref[...].reshape(bw * n, cp)
    out = jnp.dot(ctx, wproj_ref[...], preferred_element_type=jnp.float32)
    out = out + bproj_ref[...]
    out_ref[...] = out.reshape(bw, n, cp).astype(out_ref.dtype)


# ----------------------------------------------------------------------------
# Block sizing / VMEM budgeting
# ----------------------------------------------------------------------------
def _pick_block_windows(B_, N, Cp):
    """Largest divisor of B_ whose per-step VMEM footprint fits a conservative
    budget, preferring an even number of grid steps (v7x megacore)."""
    per_window = (
        N * Cp * 2 * 2        # x block, bf16, double buffered
        + N * Cp * 4 * 2      # out block, f32, double buffered
        + N * Cp * 2          # ctx scratch, bf16
        + N * 3 * Cp * 6      # qkv intermediate (f32 + bf16 copies)
        + N * N * 12          # per-head attention temporaries
    )
    budget = 12 * 1024 * 1024  # leaves weight/pipeline headroom even on v7x
    cap = max(1, min(B_, budget // max(per_window, 1)))
    divisors = [d for d in range(1, B_ + 1) if B_ % d == 0 and d <= cap]
    even_steps = [d for d in divisors if (B_ // d) % 2 == 0]
    pool = even_steps if even_steps else divisors
    return max(pool)


def _vmem_limit_bytes():
    try:
        cap = int(pltpu.get_tpu_info().vmem_capacity_bytes)
        return max(32 * 1024 * 1024, (cap * 3) // 4)
    except Exception:
        return 48 * 1024 * 1024   # safe on v5e/v6e (128 MiB) and v7x (64 MiB)


# ----------------------------------------------------------------------------
# Wrapper
# ----------------------------------------------------------------------------
def window_attention(x, params, *, num_heads, window_size, mask=None,
                     block_windows=None):
    """x: (B_, N, C) float32 with N == window_size[0]*window_size[1]."""
    if mask is not None:
        # TODO(synk): masked (shifted-window) attention path not implemented.
        raise NotImplementedError("mask is not supported by this Pallas kernel")

    B_, N, C = x.shape
    assert N == window_size[0] * window_size[1]
    assert C % num_heads == 0
    head_dim = C // num_heads
    scale = head_dim ** (-0.5)
    f32 = jnp.float32

    # Zero-pad channels to a lane-dense multiple of 128; q|k|v occupy separate
    # Cp-wide, lane-aligned column blocks.  Padded columns have zero weights
    # and biases, contribute nothing, and are sliced off at the end.
    Cp = _round_up(C, 128)
    wq = params["wqkv"][:, :C] * scale          # fold q-scale into the weight
    wk = params["wqkv"][:, C:2 * C]
    wv = params["wqkv"][:, 2 * C:]
    wqkv_p = jnp.zeros((Cp, 3 * Cp), f32)
    wqkv_p = wqkv_p.at[:C, 0:C].set(wq)
    wqkv_p = wqkv_p.at[:C, Cp:Cp + C].set(wk)
    wqkv_p = wqkv_p.at[:C, 2 * Cp:2 * Cp + C].set(wv)
    bqkv_p = jnp.zeros((3 * Cp,), f32)
    bqkv_p = bqkv_p.at[0:C].set(params["bqkv"][:C] * scale)
    bqkv_p = bqkv_p.at[Cp:Cp + C].set(params["bqkv"][C:2 * C])
    bqkv_p = bqkv_p.at[2 * Cp:2 * Cp + C].set(params["bqkv"][2 * C:])
    wproj_p = jnp.zeros((Cp, Cp), f32).at[:C, :C].set(params["wproj"])
    bproj_p = jnp.zeros((Cp,), f32).at[:C].set(params["bproj"])

    # bf16 operands for the MXU (accumulation stays f32 inside the kernel).
    x_p = x if Cp == C else jnp.pad(x, ((0, 0), (0, 0), (0, Cp - C)))
    x_p = x_p.astype(jnp.bfloat16)
    wqkv_p = wqkv_p.astype(jnp.bfloat16)
    wproj_p = wproj_p.astype(jnp.bfloat16)
    bqkv_p = bqkv_p[None, :]                       # (1, 3Cp) f32
    bproj_p = bproj_p[None, :]                     # (1, Cp)  f32

    # Dense relative-position bias, gathered once (wrapper side, f32).
    rpb = _dense_relative_position_bias(params["rpb_table"],
                                        window_size).astype(f32)

    bw = (block_windows if block_windows is not None
          else _pick_block_windows(B_, N, Cp))
    assert B_ % bw == 0
    grid = (B_ // bw,)

    kernel = functools.partial(_window_attention_kernel,
                               num_heads=num_heads, head_dim=head_dim)

    def build(single_buffer_consts):
        def const_spec(shape):
            ndim = len(shape)

            def index_map(b):
                return (0,) * ndim

            if single_buffer_consts:
                return pl.BlockSpec(shape, index_map,
                                    pipeline_mode=pl.Buffered(1))
            return pl.BlockSpec(shape, index_map)

        return pl.pallas_call(
            kernel,
            out_shape=jax.ShapeDtypeStruct((B_, N, Cp), x.dtype),
            grid_spec=pltpu.PrefetchScalarGridSpec(
                num_scalar_prefetch=0,
                grid=grid,
                in_specs=[
                    pl.BlockSpec((bw, N, Cp), lambda b: (b, 0, 0)),   # x
                    const_spec((Cp, 3 * Cp)),                         # qkv W
                    const_spec((1, 3 * Cp)),                          # qkv b
                    const_spec((num_heads, N, N)),                    # rel-pos
                    const_spec((Cp, Cp)),                             # proj W
                    const_spec((1, Cp)),                              # proj b
                ],
                out_specs=pl.BlockSpec((bw, N, Cp), lambda b: (b, 0, 0)),
                scratch_shapes=[pltpu.VMEM((bw, N, Cp), jnp.bfloat16)],
            ),
            compiler_params=pltpu.CompilerParams(
                dimension_semantics=("parallel",),
                vmem_limit_bytes=_vmem_limit_bytes(),
            ),
        )

    args = (x_p, wqkv_p, bqkv_p, rpb, wproj_p, bproj_p)
    try:
        out_p = build(single_buffer_consts=True)(*args)
    except Exception:
        # pl.Buffered(1) not supported on this jax version -> default buffers.
        out_p = build(single_buffer_consts=False)(*args)

    return out_p if Cp == C else out_p[:, :, :C]


# ----------------------------------------------------------------------------
# Pure-JAX reference (same math as the PyTorch module, mask=None, eval mode)
# ----------------------------------------------------------------------------
def window_attention_ref(x, params, *, num_heads, window_size):
    hi = jax.lax.Precision.HIGHEST
    B_, N, C = x.shape
    D = C // num_heads
    scale = D ** (-0.5)

    qkv = jnp.einsum("bnc,ck->bnk", x, params["wqkv"], precision=hi)
    qkv = qkv + params["bqkv"]
    qkv = qkv.reshape(B_, N, 3, num_heads, D).transpose(2, 0, 3, 1, 4)
    q, k, v = qkv[0] * scale, qkv[1], qkv[2]                  # (B_,H,N,D)

    attn = jnp.einsum("bhnd,bhmd->bhnm", q, k, precision=hi)
    attn = attn + _dense_relative_position_bias(
        params["rpb_table"], window_size)[None]
    attn = jax.nn.softmax(attn, axis=-1)

    out = jnp.einsum("bhnm,bhmd->bhnd", attn, v, precision=hi)
    out = jnp.transpose(out, (0, 2, 1, 3)).reshape(B_, N, C)
    return jnp.einsum("bnc,cd->bnd", out, params["wproj"],
                      precision=hi) + params["bproj"]


def make_params(key, *, dim, num_heads, window_size):
    ks = jax.random.split(key, 5)
    wh, ww = window_size
    table_len = (2 * wh - 1) * (2 * ww - 1)
    return {
        # stored input-major so the kernel computes y = x @ W (PyTorch's
        # nn.Linear stores (out, in): transpose when importing checkpoints,
        # preserving the (3, H, D) column ordering).
        "wqkv": jax.random.normal(ks[0], (dim, 3 * dim), jnp.float32) * 0.05,
        "bqkv": jax.random.normal(ks[1], (3 * dim,), jnp.float32) * 0.02,
        "rpb_table": jax.random.normal(ks[2], (table_len, num_heads),
                                       jnp.float32) * 0.02,
        "wproj": jax.random.normal(ks[3], (dim, dim), jnp.float32) * 0.05,
        "bproj": jax.random.normal(ks[4], (dim,), jnp.float32) * 0.02,
    }


if __name__ == "__main__":
    key = jax.random.PRNGKey(0)
    k_x, k_p = jax.random.split(key)

    # Small shapes consistent with the module: 2 windows of 4x4, dim=32, 4 heads.
    B_, num_heads, window_size, dim = 2, 4, (4, 4), 32
    N = window_size[0] * window_size[1]

    x = jax.random.normal(k_x, (B_, N, dim), jnp.float32)
    params = make_params(k_p, dim=dim, num_heads=num_heads,
                         window_size=window_size)

    out = window_attention(x, params, num_heads=num_heads,
                           window_size=window_size)
    out = jax.block_until_ready(out)

    ref = window_attention_ref(x, params, num_heads=num_heads,
                               window_size=window_size)
    assert out.shape == (B_, N, dim)
    err = float(jnp.max(jnp.abs(out - ref)))
    # bf16 matmuls + approx reciprocal => relaxed tolerance vs the f32 reference
    if not (err < 2e-2):
        raise AssertionError(
            f"Pallas WindowAttention mismatch vs JAX reference (max abs err {err})")

    print("KERNEL_OK")
</pallas_src>

<mosaic_0001>
module attributes {stable_mosaic.version = 11 : i64} {
  func.func @_window_attention_kernel(%arg0: i32, %arg1: memref<1x16x128xbf16, #tpu.memory_space<vmem>>, %arg2: memref<128x384xbf16, #tpu.memory_space<vmem>>, %arg3: memref<1x384xf32, #tpu.memory_space<vmem>>, %arg4: memref<4x16x16xf32, #tpu.memory_space<vmem>>, %arg5: memref<128x128xbf16, #tpu.memory_space<vmem>>, %arg6: memref<1x128xf32, #tpu.memory_space<vmem>>, %arg7: memref<1x16x128xf32, #tpu.memory_space<vmem>>, %arg8: memref<1x16x128xbf16, #tpu.memory_space<vmem>>) attributes {dimension_semantics = [#tpu.dimension_semantics<parallel>], iteration_bounds = array<i64: 2>, scalar_prefetch = 0 : i64, scratch_operands = 1 : i64, tpu.core_type = #tpu.core_type<tc>, window_params = [{transform_indices = @transform_0, window_bounds = array<i64: 1, 16, 128>}, {pipeline_mode = #tpu.pipeline_mode<synchronous>, transform_indices = @transform_1, window_bounds = array<i64: 128, 384>}, {pipeline_mode = #tpu.pipeline_mode<synchronous>, transform_indices = @transform_2, window_bounds = array<i64: 1, 384>}, {pipeline_mode = #tpu.pipeline_mode<synchronous>, transform_indices = @transform_3, window_bounds = array<i64: 4, 16, 16>}, {pipeline_mode = #tpu.pipeline_mode<synchronous>, transform_indices = @transform_4, window_bounds = array<i64: 128, 128>}, {pipeline_mode = #tpu.pipeline_mode<synchronous>, transform_indices = @transform_5, window_bounds = array<i64: 1, 128>}, {transform_indices = @transform_6, window_bounds = array<i64: 1, 16, 128>}]} {
    %cst = arith.constant 0.000000e+00 : bf16
    %0 = vector.broadcast %cst : bf16 to vector<1x16x96xbf16>
    %c0 = arith.constant 0 : index
    %c0_0 = arith.constant 0 : index
    %c32 = arith.constant 32 : index
    %1 = vector.load %arg8[%c0, %c0_0, %c32] : memref<1x16x128xbf16, #tpu.memory_space<vmem>>, vector<1x16x96xbf16>
    tpu.vector_store %arg8[%c0, %c0_0, %c32], %0 {strides = array<i32>} : memref<1x16x128xbf16, #tpu.memory_space<vmem>>, vector<1x16x96xbf16>,
    %c0_1 = arith.constant 0 : index
    %c0_2 = arith.constant 0 : index
    %c0_3 = arith.constant 0 : index
    %2 = vector.load %arg1[%c0_1, %c0_2, %c0_3] : memref<1x16x128xbf16, #tpu.memory_space<vmem>>, vector<1x16x128xbf16>
    %3 = vector.shape_cast %2 : vector<1x16x128xbf16> to vector<16x128xbf16>
    %c0_4 = arith.constant 0 : index
    %c0_5 = arith.constant 0 : index
    %4 = vector.load %arg2[%c0_4, %c0_5] : memref<128x384xbf16, #tpu.memory_space<vmem>>, vector<128x384xbf16>
    %cst_6 = arith.constant dense<0.000000e+00> : vector<16x384xf32>
    %5 = tpu.matmul %3, %4, %cst_6 {dimension_numbers = #tpu.dot_dimension_numbers<[1], [0], [0], [1], [0, 0, 1, 1], [], []>} : vector<16x128xbf16>, vector<128x384xbf16>, vector<16x384xf32> -> vector<16x384xf32>
    %c0_7 = arith.constant 0 : index
    %c0_8 = arith.constant 0 : index
    %6 = vector.load %arg3[%c0_7, %c0_8] : memref<1x384xf32, #tpu.memory_space<vmem>>, vector<1x384xf32>
    %7 = vector.broadcast %6 : vector<1x384xf32> to vector<16x384xf32>
    %8 = arith.addf %5, %7 : vector<16x384xf32>
    %9 = arith.truncf %8 : vector<16x384xf32> to vector<16x384xbf16>
    %10 = vector.shape_cast %9 : vector<16x384xbf16> to vector<1x16x384xbf16>
    %11 = vector.extract_strided_slice %10 {offsets = [0, 0, 0], sizes = [1, 16, 8], strides = [1, 1, 1]} : vector<1x16x384xbf16> to vector<1x16x8xbf16>
    %12 = vector.extract_strided_slice %10 {offsets = [0, 0, 128], sizes = [1, 16, 8], strides = [1, 1, 1]} : vector<1x16x384xbf16> to vector<1x16x8xbf16>
    %13 = vector.extract_strided_slice %10 {offsets = [0, 0, 256], sizes = [1, 16, 8], strides = [1, 1, 1]} : vector<1x16x384xbf16> to vector<1x16x8xbf16>
    "tpu.trace_start"() <{level = 10 : i32, message = "bnd,bmd->bnm"}> : () -> ()
    %cst_9 = arith.constant dense<0.000000e+00> : vector<1x16x16xf32>
    %14 = tpu.matmul %11, %12, %cst_9 {dimension_numbers = #tpu.dot_dimension_numbers<[2], [2], [1], [1], [0, 0, 0, 1, 1, 1], [0], [0]>} : vector<1x16x8xbf16>, vector<1x16x8xbf16>, vector<1x16x16xf32> -> vector<1x16x16xf32>
    "tpu.trace_stop"() : () -> ()
    %c0_10 = arith.constant 0 : index
    %c0_11 = arith.constant 0 : index
    %c0_12 = arith.constant 0 : index
    %15 = vector.load %arg4[%c0_10, %c0_11, %c0_12] : memref<4x16x16xf32, #tpu.memory_space<vmem>>, vector<1x16x16xf32>
    %16 = vector.shape_cast %15 : vector<1x16x16xf32> to vector<16x16xf32>
    %17 = vector.shape_cast %16 : vector<16x16xf32> to vector<1x16x16xf32>
    %18 = arith.addf %14, %17 : vector<1x16x16xf32>
    %cst_13 = arith.constant dense<0xFF800000> : vector<1x16xf32>
    %19 = vector.multi_reduction <maximumf>, %18, %cst_13 [2] : vector<1x16x16xf32> to vector<1x16xf32>
    %20 = vector.shape_cast %19 : vector<1x16xf32> to vector<1x16x1xf32>
    %21 = vector.broadcast %20 : vector<1x16x1xf32> to vector<1x16x16xf32>
    %22 = arith.subf %18, %21 : vector<1x16x16xf32>
    %23 = math.exp %22 : vector<1x16x16xf32>
    %cst_14 = arith.constant dense<0.000000e+00> : vector<1x16xf32>
    %24 = vector.multi_reduction <add>, %23, %cst_14 [2] : vector<1x16x16xf32> to vector<1x16xf32>
    %25 = vector.shape_cast %24 : vector<1x16xf32> to vector<1x16x1xf32>
    %26 = tpu.reciprocal %25 {approx = true} : vector<1x16x1xf32> -> vector<1x16x1xf32>
    %27 = vector.broadcast %26 : vector<1x16x1xf32> to vector<1x16x16xf32>
    %28 = arith.mulf %23, %27 : vector<1x16x16xf32>
    %29 = arith.truncf %28 : vector<1x16x16xf32> to vector<1x16x16xbf16>
    "tpu.trace_start"() <{level = 10 : i32, message = "bnm,bmd->bnd"}> : () -> ()
    %cst_15 = arith.constant dense<0.000000e+00> : vector<1x16x8xf32>
    %30 = tpu.matmul %29, %13, %cst_15 {dimension_numbers = #tpu.dot_dimension_numbers<[2], [1], [1], [2], [0, 0, 0, 1, 1, 2], [0], [0]>} : vector<1x16x16xbf16>, vector<1x16x8xbf16>, vector<1x16x8xf32> -> vector<1x16x8xf32>
    "tpu.trace_stop"() : () -> ()
    %31 = arith.truncf %30 : vector<1x16x8xf32> to vector<1x16x8xbf16>
    %c0_16 = arith.constant 0 : index
    %c0_17 = arith.constant 0 : index
    %c0_18 = arith.constant 0 : index
    %32 = vector.load %arg8[%c0_16, %c0_17, %c0_18] : memref<1x16x128xbf16, #tpu.memory_space<vmem>>, vector<1x16x8xbf16>
    tpu.vector_store %arg8[%c0_16, %c0_17, %c0_18], %31 {strides = array<i32>} : memref<1x16x128xbf16, #tpu.memory_space<vmem>>, vector<1x16x8xbf16>,
    %33 = vector.extract_strided_slice %10 {offsets = [0, 0, 8], sizes = [1, 16, 8], strides = [1, 1, 1]} : vector<1x16x384xbf16> to vector<1x16x8xbf16>
    %34 = vector.extract_strided_slice %10 {offsets = [0, 0, 136], sizes = [1, 16, 8], strides = [1, 1, 1]} : vector<1x16x384xbf16> to vector<1x16x8xbf16>
    %35 = vector.extract_strided_slice %10 {offsets = [0, 0, 264], sizes = [1, 16, 8], strides = [1, 1, 1]} : vector<1x16x384xbf16> to vector<1x16x8xbf16>
    "tpu.trace_start"() <{level = 10 : i32, message = "bnd,bmd->bnm"}> : () -> ()
    %cst_19 = arith.constant dense<0.000000e+00> : vector<1x16x16xf32>
    %36 = tpu.matmul %33, %34, %cst_19 {dimension_numbers = #tpu.dot_dimension_numbers<[2], [2], [1], [1], [0, 0, 0, 1, 1, 1], [0], [0]>} : vector<1x16x8xbf16>, vector<1x16x8xbf16>, vector<1x16x16xf32> -> vector<1x16x16xf32>
    "tpu.trace_stop"() : () -> ()
    %c1 = arith.constant 1 : index
    %c0_20 = arith.constant 0 : index
    %c0_21 = arith.constant 0 : index
    %37 = vector.load %arg4[%c1, %c0_20, %c0_21] : memref<4x16x16xf32, #tpu.memory_space<vmem>>, vector<1x16x16xf32>
    %38 = vector.shape_cast %37 : vector<1x16x16xf32> to vector<16x16xf32>
    %39 = vector.shape_cast %38 : vector<16x16xf32> to vector<1x16x16xf32>
    %40 = arith.addf %36, %39 : vector<1x16x16xf32>
    %cst_22 = arith.constant dense<0xFF800000> : vector<1x16xf32>
    %41 = vector.multi_reduction <maximumf>, %40, %cst_22 [2] : vector<1x16x16xf32> to vector<1x16xf32>
    %42 = vector.shape_cast %41 : vector<1x16xf32> to vector<1x16x1xf32>
    %43 = vector.broadcast %42 : vector<1x16x1xf32> to vector<1x16x16xf32>
    %44 = arith.subf %40, %43 : vector<1x16x16xf32>
    %45 = math.exp %44 : vector<1x16x16xf32>
    %cst_23 = arith.constant dense<0.000000e+00> : vector<1x16xf32>
    %46 = vector.multi_reduction <add>, %45, %cst_23 [2] : vector<1x16x16xf32> to vector<1x16xf32>
    %47 = vector.shape_cast %46 : vector<1x16xf32> to vector<1x16x1xf32>
    %48 = tpu.reciprocal %47 {approx = true} : vector<1x16x1xf32> -> vector<1x16x1xf32>
    %49 = vector.broadcast %48 : vector<1x16x1xf32> to vector<1x16x16xf32>
    %50 = arith.mulf %45, %49 : vector<1x16x16xf32>
    %51 = arith.truncf %50 : vector<1x16x16xf32> to vector<1x16x16xbf16>
    "tpu.trace_start"() <{level = 10 : i32, message = "bnm,bmd->bnd"}> : () -> ()
    %cst_24 = arith.constant dense<0.000000e+00> : vector<1x16x8xf32>
    %52 = tpu.matmul %51, %35, %cst_24 {dimension_numbers = #tpu.dot_dimension_numbers<[2], [1], [1], [2], [0, 0, 0, 1, 1, 2], [0], [0]>} : vector<1x16x16xbf16>, vector<1x16x8xbf16>, vector<1x16x8xf32> -> vector<1x16x8xf32>
    "tpu.trace_stop"() : () -> ()
    %53 = arith.truncf %52 : vector<1x16x8xf32> to vector<1x16x8xbf16>
    %c0_25 = arith.constant 0 : index
    %c0_26 = arith.constant 0 : index
    %c8 = arith.constant 8 : index
    %54 = vector.load %arg8[%c0_25, %c0_26, %c8] : memref<1x16x128xbf16, #tpu.memory_space<vmem>>, vector<1x16x8xbf16>
    tpu.vector_store %arg8[%c0_25, %c0_26, %c8], %53 {strides = array<i32>} : memref<1x16x128xbf16, #tpu.memory_space<vmem>>, vector<1x16x8xbf16>,
    %55 = vector.extract_strided_slice %10 {offsets = [0, 0, 16], sizes = [1, 16, 8], strides = [1, 1, 1]} : vector<1x16x384xbf16> to vector<1x16x8xbf16>
    %56 = vector.extract_strided_slice %10 {offsets = [0, 0, 144], sizes = [1, 16, 8], strides = [1, 1, 1]} : vector<1x16x384xbf16> to vector<1x16x8xbf16>
    %57 = vector.extract_strided_slice %10 {offsets = [0, 0, 272], sizes = [1, 16, 8], strides = [1, 1, 1]} : vector<1x16x384xbf16> to vector<1x16x8xbf16>
    "tpu.trace_start"() <{level = 10 : i32, message = "bnd,bmd->bnm"}> : () -> ()
    %cst_27 = arith.constant dense<0.000000e+00> : vector<1x16x16xf32>
    %58 = tpu.matmul %55, %56, %cst_27 {dimension_numbers = #tpu.dot_dimension_numbers<[2], [2], [1], [1], [0, 0, 0, 1, 1, 1], [0], [0]>} : vector<1x16x8xbf16>, vector<1x16x8xbf16>, vector<1x16x16xf32> -> vector<1x16x16xf32>
    "tpu.trace_stop"() : () -> ()
    %c2 = arith.constant 2 : index
    %c0_28 = arith.constant 0 : index
    %c0_29 = arith.constant 0 : index
    %59 = vector.load %arg4[%c2, %c0_28, %c0_29] : memref<4x16x16xf32, #tpu.memory_space<vmem>>, vector<1x16x16xf32>
    %60 = vector.shape_cast %59 : vector<1x16x16xf32> to vector<16x16xf32>
    %61 = vector.shape_cast %60 : vector<16x16xf32> to vector<1x16x16xf32>
    %62 = arith.addf %58, %61 : vector<1x16x16xf32>
    %cst_30 = arith.constant dense<0xFF800000> : vector<1x16xf32>
    %63 = vector.multi_reduction <maximumf>, %62, %cst_30 [2] : vector<1x16x16xf32> to vector<1x16xf32>
    %64 = vector.shape_cast %63 : vector<1x16xf32> to vector<1x16x1xf32>
    %65 = vector.broadcast %64 : vector<1x16x1xf32> to vector<1x16x16xf32>
    %66 = arith.subf %62, %65 : vector<1x16x16xf32>
    %67 = math.exp %66 : vector<1x16x16xf32>
    %cst_31 = arith.constant dense<0.000000e+00> : vector<1x16xf32>
    %68 = vector.multi_reduction <add>, %67, %cst_31 [2] : vector<1x16x16xf32> to vector<1x16xf32>
    %69 = vector.shape_cast %68 : vector<1x16xf32> to vector<1x16x1xf32>
    %70 = tpu.reciprocal %69 {approx = true} : vector<1x16x1xf32> -> vector<1x16x1xf32>
    %71 = vector.broadcast %70 : vector<1x16x1xf32> to vector<1x16x16xf32>
    %72 = arith.mulf %67, %71 : vector<1x16x16xf32>
    %73 = arith.truncf %72 : vector<1x16x16xf32> to vector<1x16x16xbf16>
    "tpu.trace_start"() <{level = 10 : i32, message = "bnm,bmd->bnd"}> : () -> ()
    %cst_32 = arith.constant dense<0.000000e+00> : vector<1x16x8xf32>
    %74 = tpu.matmul %73, %57, %cst_32 {dimension_numbers = #tpu.dot_dimension_numbers<[2], [1], [1], [2], [0, 0, 0, 1, 1, 2], [0], [0]>} : vector<1x16x16xbf16>, vector<1x16x8xbf16>, vector<1x16x8xf32> -> vector<1x16x8xf32>
    "tpu.trace_stop"() : () -> ()
    %75 = arith.truncf %74 : vector<1x16x8xf32> to vector<1x16x8xbf16>
    %c0_33 = arith.constant 0 : index
    %c0_34 = arith.constant 0 : index
    %c16 = arith.constant 16 : index
    %76 = vector.load %arg8[%c0_33, %c0_34, %c16] : memref<1x16x128xbf16, #tpu.memory_space<vmem>>, vector<1x16x8xbf16>
    tpu.vector_store %arg8[%c0_33, %c0_34, %c16], %75 {strides = array<i32>} : memref<1x16x128xbf16, #tpu.memory_space<vmem>>, vector<1x16x8xbf16>,
    %77 = vector.extract_strided_slice %10 {offsets = [0, 0, 24], sizes = [1, 16, 8], strides = [1, 1, 1]} : vector<1x16x384xbf16> to vector<1x16x8xbf16>
    %78 = vector.extract_strided_slice %10 {offsets = [0, 0, 152], sizes = [1, 16, 8], strides = [1, 1, 1]} : vector<1x16x384xbf16> to vector<1x16x8xbf16>
    %79 = vector.extract_strided_slice %10 {offsets = [0, 0, 280], sizes = [1, 16, 8], strides = [1, 1, 1]} : vector<1x16x384xbf16> to vector<1x16x8xbf16>
    "tpu.trace_start"() <{level = 10 : i32, message = "bnd,bmd->bnm"}> : () -> ()
    %cst_35 = arith.constant dense<0.000000e+00> : vector<1x16x16xf32>
    %80 = tpu.matmul %77, %78, %cst_35 {dimension_numbers = #tpu.dot_dimension_numbers<[2], [2], [1], [1], [0, 0, 0, 1, 1, 1], [0], [0]>} : vector<1x16x8xbf16>, vector<1x16x8xbf16>, vector<1x16x16xf32> -> vector<1x16x16xf32>
    "tpu.trace_stop"() : () -> ()
    %c3 = arith.constant 3 : index
    %c0_36 = arith.constant 0 : index
    %c0_37 = arith.constant 0 : index
    %81 = vector.load %arg4[%c3, %c0_36, %c0_37] : memref<4x16x16xf32, #tpu.memory_space<vmem>>, vector<1x16x16xf32>
    %82 = vector.shape_cast %81 : vector<1x16x16xf32> to vector<16x16xf32>
    %83 = vector.shape_cast %82 : vector<16x16xf32> to vector<1x16x16xf32>
    %84 = arith.addf %80, %83 : vector<1x16x16xf32>
    %cst_38 = arith.constant dense<0xFF800000> : vector<1x16xf32>
    %85 = vector.multi_reduction <maximumf>, %84, %cst_38 [2] : vector<1x16x16xf32> to vector<1x16xf32>
    %86 = vector.shape_cast %85 : vector<1x16xf32> to vector<1x16x1xf32>
    %87 = vector.broadcast %86 : vector<1x16x1xf32> to vector<1x16x16xf32>
    %88 = arith.subf %84, %87 : vector<1x16x16xf32>
    %89 = math.exp %88 : vector<1x16x16xf32>
    %cst_39 = arith.constant dense<0.000000e+00> : vector<1x16xf32>
    %90 = vector.multi_reduction <add>, %89, %cst_39 [2] : vector<1x16x16xf32> to vector<1x16xf32>
    %91 = vector.shape_cast %90 : vector<1x16xf32> to vector<1x16x1xf32>
    %92 = tpu.reciprocal %91 {approx = true} : vector<1x16x1xf32> -> vector<1x16x1xf32>
    %93 = vector.broadcast %92 : vector<1x16x1xf32> to vector<1x16x16xf32>
    %94 = arith.mulf %89, %93 : vector<1x16x16xf32>
    %95 = arith.truncf %94 : vector<1x16x16xf32> to vector<1x16x16xbf16>
    "tpu.trace_start"() <{level = 10 : i32, message = "bnm,bmd->bnd"}> : () -> ()
    %cst_40 = arith.constant dense<0.000000e+00> : vector<1x16x8xf32>
    %96 = tpu.matmul %95, %79, %cst_40 {dimension_numbers = #tpu.dot_dimension_numbers<[2], [1], [1], [2], [0, 0, 0, 1, 1, 2], [0], [0]>} : vector<1x16x16xbf16>, vector<1x16x8xbf16>, vector<1x16x8xf32> -> vector<1x16x8xf32>
    "tpu.trace_stop"() : () -> ()
    %97 = arith.truncf %96 : vector<1x16x8xf32> to vector<1x16x8xbf16>
    %c0_41 = arith.constant 0 : index
    %c0_42 = arith.constant 0 : index
    %c24 = arith.constant 24 : index
    %98 = vector.load %arg8[%c0_41, %c0_42, %c24] : memref<1x16x128xbf16, #tpu.memory_space<vmem>>, vector<1x16x8xbf16>
    tpu.vector_store %arg8[%c0_41, %c0_42, %c24], %97 {strides = array<i32>} : memref<1x16x128xbf16, #tpu.memory_space<vmem>>, vector<1x16x8xbf16>,
    %c0_43 = arith.constant 0 : index
    %c0_44 = arith.constant 0 : index
    %c0_45 = arith.constant 0 : index
    %99 = vector.load %arg8[%c0_43, %c0_44, %c0_45] : memref<1x16x128xbf16, #tpu.memory_space<vmem>>, vector<1x16x128xbf16>
    %100 = vector.shape_cast %99 : vector<1x16x128xbf16> to vector<16x128xbf16>
    %c0_46 = arith.constant 0 : index
    %c0_47 = arith.constant 0 : index
    %101 = vector.load %arg5[%c0_46, %c0_47] : memref<128x128xbf16, #tpu.memory_space<vmem>>, vector<128x128xbf16>
    %cst_48 = arith.constant dense<0.000000e+00> : vector<16x128xf32>
    %102 = tpu.matmul %100, %101, %cst_48 {dimension_numbers = #tpu.dot_dimension_numbers<[1], [0], [0], [1], [0, 0, 1, 1], [], []>} : vector<16x128xbf16>, vector<128x128xbf16>, vector<16x128xf32> -> vector<16x128xf32>
    %c0_49 = arith.constant 0 : index
    %c0_50 = arith.constant 0 : index
    %103 = vector.load %arg6[%c0_49, %c0_50] : memref<1x128xf32, #tpu.memory_space<vmem>>, vector<1x128xf32>
    %104 = vector.broadcast %103 : vector<1x128xf32> to vector<16x128xf32>
    %105 = arith.addf %102, %104 : vector<16x128xf32>
    %106 = vector.shape_cast %105 : vector<16x128xf32> to vector<1x16x128xf32>
    %c0_51 = arith.constant 0 : index
    %c0_52 = arith.constant 0 : index
    %c0_53 = arith.constant 0 : index
    %107 = vector.load %arg7[%c0_51, %c0_52, %c0_53] : memref<1x16x128xf32, #tpu.memory_space<vmem>>, vector<1x16x128xf32>
    tpu.vector_store %arg7[%c0_51, %c0_52, %c0_53], %106 {strides = array<i32>} : memref<1x16x128xf32, #tpu.memory_space<vmem>>, vector<1x16x128xf32>,
    return
  }
  func.func @transform_0(%arg0: i32) -> (i32, i32, i32) {
    %c0_i32 = arith.constant 0 : i32
    %c0_i32_0 = arith.constant 0 : i32
    %c0_i32_1 = arith.constant 0 : i32
    return %arg0, %c0_i32, %c0_i32_0 : i32, i32, i32
  }
  func.func @transform_1(%arg0: i32) -> (i32, i32) {
    %c0_i32 = arith.constant 0 : i32
    %c0_i32_0 = arith.constant 0 : i32
    %c0_i32_1 = arith.constant 0 : i32
    return %c0_i32, %c0_i32_0 : i32, i32
  }
  func.func @transform_2(%arg0: i32) -> (i32, i32) {
    %c0_i32 = arith.constant 0 : i32
    %c0_i32_0 = arith.constant 0 : i32
    %c0_i32_1 = arith.constant 0 : i32
    return %c0_i32, %c0_i32_0 : i32, i32
  }
  func.func @transform_3(%arg0: i32) -> (i32, i32, i32) {
    %c0_i32 = arith.constant 0 : i32
    %c0_i32_0 = arith.constant 0 : i32
    %c0_i32_1 = arith.constant 0 : i32
    %c0_i32_2 = arith.constant 0 : i32
    return %c0_i32, %c0_i32_0, %c0_i32_1 : i32, i32, i32
  }
  func.func @transform_4(%arg0: i32) -> (i32, i32) {
    %c0_i32 = arith.constant 0 : i32
    %c0_i32_0 = arith.constant 0 : i32
    %c0_i32_1 = arith.constant 0 : i32
    return %c0_i32, %c0_i32_0 : i32, i32
  }
  func.func @transform_5(%arg0: i32) -> (i32, i32) {
    %c0_i32 = arith.constant 0 : i32
    %c0_i32_0 = arith.constant 0 : i32
    %c0_i32_1 = arith.constant 0 : i32
    return %c0_i32, %c0_i32_0 : i32, i32
  }
  func.func @transform_6(%arg0: i32) -> (i32, i32, i32) {
    %c0_i32 = arith.constant 0 : i32
    %c0_i32_0 = arith.constant 0 : i32
    %c0_i32_1 = arith.constant 0 : i32
    return %arg0, %c0_i32, %c0_i32_0 : i32, i32, i32
  }
}

module attributes {stable_mosaic.version = 11 : i64} {
  func.func @_window_attention_kernel(%arg0: i32, %arg1: memref<1x16x128xbf16, #tpu.memory_space<vmem>>, %arg2: memref<128x384xbf16, #tpu.memory_space<vmem>>, %arg3: memref<1x384xf32, #tpu.memory_space<vmem>>, %arg4: memref<4x16x16xf32, #tpu.memory_space<vmem>>, %arg5: memref<128x128xbf16, #tpu.memory_space<vmem>>, %arg6: memref<1x128xf32, #tpu.memory_space<vmem>>, %arg7: memref<1x16x128xf32, #tpu.memory_space<vmem>>, %arg8: memref<1x16x128xbf16, #tpu.memory_space<vmem>>) attributes {dimension_semantics = [#tpu.dimension_semantics<parallel>], iteration_bounds = array<i64: 2>, scalar_prefetch = 0 : i64, scratch_operands = 1 : i64, tpu.core_type = #tpu.core_type<tc>, window_params = [{transform_indices = @transform_0, window_bounds = array<i64: 1, 16, 128>}, {pipeline_mode = #tpu.pipeline_mode<synchronous>, transform_indices = @transform_1, window_bounds = array<i64: 128, 384>}, {pipeline_mode = #tpu.pipeline_mode<synchronous>, transform_indices = @transform_2, window_bounds = array<i64: 1, 384>}, {pipeline_mode = #tpu.pipeline_mode<synchronous>, transform_indices = @transform_3, window_bounds = array<i64: 4, 16, 16>}, {pipeline_mode = #tpu.pipeline_mode<synchronous>, transform_indices = @transform_4, window_bounds = array<i64: 128, 128>}, {pipeline_mode = #tpu.pipeline_mode<synchronous>, transform_indices = @transform_5, window_bounds = array<i64: 1, 128>}, {transform_indices = @transform_6, window_bounds = array<i64: 1, 16, 128>}]} {
    %cst = arith.constant 0.000000e+00 : bf16
    %0 = vector.broadcast %cst : bf16 to vector<1x16x96xbf16>
    %c0 = arith.constant 0 : index
    %c0_0 = arith.constant 0 : index
    %c32 = arith.constant 32 : index
    %1 = vector.load %arg8[%c0, %c0_0, %c32] : memref<1x16x128xbf16, #tpu.memory_space<vmem>>, vector<1x16x96xbf16>
    tpu.vector_store %arg8[%c0, %c0_0, %c32], %0 {strides = array<i32>} : memref<1x16x128xbf16, #tpu.memory_space<vmem>>, vector<1x16x96xbf16>,
    %c0_1 = arith.constant 0 : index
    %c0_2 = arith.constant 0 : index
    %c0_3 = arith.constant 0 : index
    %2 = vector.load %arg1[%c0_1, %c0_2, %c0_3] : memref<1x16x128xbf16, #tpu.memory_space<vmem>>, vector<1x16x128xbf16>
    %3 = vector.shape_cast %2 : vector<1x16x128xbf16> to vector<16x128xbf16>
    %c0_4 = arith.constant 0 : index
    %c0_5 = arith.constant 0 : index
    %4 = vector.load %arg2[%c0_4, %c0_5] : memref<128x384xbf16, #tpu.memory_space<vmem>>, vector<128x384xbf16>
    %cst_6 = arith.constant dense<0.000000e+00> : vector<16x384xf32>
    %5 = tpu.matmul %3, %4, %cst_6 {dimension_numbers = #tpu.dot_dimension_numbers<[1], [0], [0], [1], [0, 0, 1, 1], [], []>} : vector<16x128xbf16>, vector<128x384xbf16>, vector<16x384xf32> -> vector<16x384xf32>
    %c0_7 = arith.constant 0 : index
    %c0_8 = arith.constant 0 : index
    %6 = vector.load %arg3[%c0_7, %c0_8] : memref<1x384xf32, #tpu.memory_space<vmem>>, vector<1x384xf32>
    %7 = vector.broadcast %6 : vector<1x384xf32> to vector<16x384xf32>
    %8 = arith.addf %5, %7 : vector<16x384xf32>
    %9 = arith.truncf %8 : vector<16x384xf32> to vector<16x384xbf16>
    %10 = vector.shape_cast %9 : vector<16x384xbf16> to vector<1x16x384xbf16>
    %11 = vector.extract_strided_slice %10 {offsets = [0, 0, 0], sizes = [1, 16, 8], strides = [1, 1, 1]} : vector<1x16x384xbf16> to vector<1x16x8xbf16>
    %12 = vector.extract_strided_slice %10 {offsets = [0, 0, 128], sizes = [1, 16, 8], strides = [1, 1, 1]} : vector<1x16x384xbf16> to vector<1x16x8xbf16>
    %13 = vector.extract_strided_slice %10 {offsets = [0, 0, 256], sizes = [1, 16, 8], strides = [1, 1, 1]} : vector<1x16x384xbf16> to vector<1x16x8xbf16>
    "tpu.trace_start"() <{level = 10 : i32, message = "bnd,bmd->bnm"}> : () -> ()
    %cst_9 = arith.constant dense<0.000000e+00> : vector<1x16x16xf32>
    %14 = tpu.matmul %11, %12, %cst_9 {dimension_numbers = #tpu.dot_dimension_numbers<[2], [2], [1], [1], [0, 0, 0, 1, 1, 1], [0], [0]>} : vector<1x16x8xbf16>, vector<1x16x8xbf16>, vector<1x16x16xf32> -> vector<1x16x16xf32>
    "tpu.trace_stop"() : () -> ()
    %c0_10 = arith.constant 0 : index
    %c0_11 = arith.constant 0 : index
    %c0_12 = arith.constant 0 : index
    %15 = vector.load %arg4[%c0_10, %c0_11, %c0_12] : memref<4x16x16xf32, #tpu.memory_space<vmem>>, vector<1x16x16xf32>
    %16 = vector.shape_cast %15 : vector<1x16x16xf32> to vector<16x16xf32>
    %17 = vector.shape_cast %16 : vector<16x16xf32> to vector<1x16x16xf32>
    %18 = arith.addf %14, %17 : vector<1x16x16xf32>
    %cst_13 = arith.constant dense<0xFF800000> : vector<1x16xf32>
    %19 = vector.multi_reduction <maximumf>, %18, %cst_13 [2] : vector<1x16x16xf32> to vector<1x16xf32>
    %20 = vector.shape_cast %19 : vector<1x16xf32> to vector<1x16x1xf32>
    %21 = vector.broadcast %20 : vector<1x16x1xf32> to vector<1x16x16xf32>
    %22 = arith.subf %18, %21 : vector<1x16x16xf32>
    %23 = math.exp %22 : vector<1x16x16xf32>
    %cst_14 = arith.constant dense<0.000000e+00> : vector<1x16xf32>
    %24 = vector.multi_reduction <add>, %23, %cst_14 [2] : vector<1x16x16xf32> to vector<1x16xf32>
    %25 = vector.shape_cast %24 : vector<1x16xf32> to vector<1x16x1xf32>
    %26 = tpu.reciprocal %25 {approx = true} : vector<1x16x1xf32> -> vector<1x16x1xf32>
    %27 = vector.broadcast %26 : vector<1x16x1xf32> to vector<1x16x16xf32>
    %28 = arith.mulf %23, %27 : vector<1x16x16xf32>
    %29 = arith.truncf %28 : vector<1x16x16xf32> to vector<1x16x16xbf16>
    "tpu.trace_start"() <{level = 10 : i32, message = "bnm,bmd->bnd"}> : () -> ()
    %cst_15 = arith.constant dense<0.000000e+00> : vector<1x16x8xf32>
    %30 = tpu.matmul %29, %13, %cst_15 {dimension_numbers = #tpu.dot_dimension_numbers<[2], [1], [1], [2], [0, 0, 0, 1, 1, 2], [0], [0]>} : vector<1x16x16xbf16>, vector<1x16x8xbf16>, vector<1x16x8xf32> -> vector<1x16x8xf32>
    "tpu.trace_stop"() : () -> ()
    %31 = arith.truncf %30 : vector<1x16x8xf32> to vector<1x16x8xbf16>
    %c0_16 = arith.constant 0 : index
    %c0_17 = arith.constant 0 : index
    %c0_18 = arith.constant 0 : index
    %32 = vector.load %arg8[%c0_16, %c0_17, %c0_18] : memref<1x16x128xbf16, #tpu.memory_space<vmem>>, vector<1x16x8xbf16>
    tpu.vector_store %arg8[%c0_16, %c0_17, %c0_18], %31 {strides = array<i32>} : memref<1x16x128xbf16, #tpu.memory_space<vmem>>, vector<1x16x8xbf16>,
    %33 = vector.extract_strided_slice %10 {offsets = [0, 0, 8], sizes = [1, 16, 8], strides = [1, 1, 1]} : vector<1x16x384xbf16> to vector<1x16x8xbf16>
    %34 = vector.extract_strided_slice %10 {offsets = [0, 0, 136], sizes = [1, 16, 8], strides = [1, 1, 1]} : vector<1x16x384xbf16> to vector<1x16x8xbf16>
    %35 = vector.extract_strided_slice %10 {offsets = [0, 0, 264], sizes = [1, 16, 8], strides = [1, 1, 1]} : vector<1x16x384xbf16> to vector<1x16x8xbf16>
    "tpu.trace_start"() <{level = 10 : i32, message = "bnd,bmd->bnm"}> : () -> ()
    %cst_19 = arith.constant dense<0.000000e+00> : vector<1x16x16xf32>
    %36 = tpu.matmul %33, %34, %cst_19 {dimension_numbers = #tpu.dot_dimension_numbers<[2], [2], [1], [1], [0, 0, 0, 1, 1, 1], [0], [0]>} : vector<1x16x8xbf16>, vector<1x16x8xbf16>, vector<1x16x16xf32> -> vector<1x16x16xf32>
    "tpu.trace_stop"() : () -> ()
    %c1 = arith.constant 1 : index
    %c0_20 = arith.constant 0 : index
    %c0_21 = arith.constant 0 : index
    %37 = vector.load %arg4[%c1, %c0_20, %c0_21] : memref<4x16x16xf32, #tpu.memory_space<vmem>>, vector<1x16x16xf32>
    %38 = vector.shape_cast %37 : vector<1x16x16xf32> to vector<16x16xf32>
    %39 = vector.shape_cast %38 : vector<16x16xf32> to vector<1x16x16xf32>
    %40 = arith.addf %36, %39 : vector<1x16x16xf32>
    %cst_22 = arith.constant dense<0xFF800000> : vector<1x16xf32>
    %41 = vector.multi_reduction <maximumf>, %40, %cst_22 [2] : vector<1x16x16xf32> to vector<1x16xf32>
    %42 = vector.shape_cast %41 : vector<1x16xf32> to vector<1x16x1xf32>
    %43 = vector.broadcast %42 : vector<1x16x1xf32> to vector<1x16x16xf32>
    %44 = arith.subf %40, %43 : vector<1x16x16xf32>
    %45 = math.exp %44 : vector<1x16x16xf32>
    %cst_23 = arith.constant dense<0.000000e+00> : vector<1x16xf32>
    %46 = vector.multi_reduction <add>, %45, %cst_23 [2] : vector<1x16x16xf32> to vector<1x16xf32>
    %47 = vector.shape_cast %46 : vector<1x16xf32> to vector<1x16x1xf32>
    %48 = tpu.reciprocal %47 {approx = true} : vector<1x16x1xf32> -> vector<1x16x1xf32>
    %49 = vector.broadcast %48 : vector<1x16x1xf32> to vector<1x16x16xf32>
    %50 = arith.mulf %45, %49 : vector<1x16x16xf32>
    %51 = arith.truncf %50 : vector<1x16x16xf32> to vector<1x16x16xbf16>
    "tpu.trace_start"() <{level = 10 : i32, message = "bnm,bmd->bnd"}> : () -> ()
    %cst_24 = arith.constant dense<0.000000e+00> : vector<1x16x8xf32>
    %52 = tpu.matmul %51, %35, %cst_24 {dimension_numbers = #tpu.dot_dimension_numbers<[2], [1], [1], [2], [0, 0, 0, 1, 1, 2], [0], [0]>} : vector<1x16x16xbf16>, vector<1x16x8xbf16>, vector<1x16x8xf32> -> vector<1x16x8xf32>
    "tpu.trace_stop"() : () -> ()
    %53 = arith.truncf %52 : vector<1x16x8xf32> to vector<1x16x8xbf16>
    %c0_25 = arith.constant 0 : index
    %c0_26 = arith.constant 0 : index
    %c8 = arith.constant 8 : index
    %54 = vector.load %arg8[%c0_25, %c0_26, %c8] : memref<1x16x128xbf16, #tpu.memory_space<vmem>>, vector<1x16x8xbf16>
    tpu.vector_store %arg8[%c0_25, %c0_26, %c8], %53 {strides = array<i32>} : memref<1x16x128xbf16, #tpu.memory_space<vmem>>, vector<1x16x8xbf16>,
    %55 = vector.extract_strided_slice %10 {offsets = [0, 0, 16], sizes = [1, 16, 8], strides = [1, 1, 1]} : vector<1x16x384xbf16> to vector<1x16x8xbf16>
    %56 = vector.extract_strided_slice %10 {offsets = [0, 0, 144], sizes = [1, 16, 8], strides = [1, 1, 1]} : vector<1x16x384xbf16> to vector<1x16x8xbf16>
    %57 = vector.extract_strided_slice %10 {offsets = [0, 0, 272], sizes = [1, 16, 8], strides = [1, 1, 1]} : vector<1x16x384xbf16> to vector<1x16x8xbf16>
    "tpu.trace_start"() <{level = 10 : i32, message = "bnd,bmd->bnm"}> : () -> ()
    %cst_27 = arith.constant dense<0.000000e+00> : vector<1x16x16xf32>
    %58 = tpu.matmul %55, %56, %cst_27 {dimension_numbers = #tpu.dot_dimension_numbers<[2], [2], [1], [1], [0, 0, 0, 1, 1, 1], [0], [0]>} : vector<1x16x8xbf16>, vector<1x16x8xbf16>, vector<1x16x16xf32> -> vector<1x16x16xf32>
    "tpu.trace_stop"() : () -> ()
    %c2 = arith.constant 2 : index
    %c0_28 = arith.constant 0 : index
    %c0_29 = arith.constant 0 : index
    %59 = vector.load %arg4[%c2, %c0_28, %c0_29] : memref<4x16x16xf32, #tpu.memory_space<vmem>>, vector<1x16x16xf32>
    %60 = vector.shape_cast %59 : vector<1x16x16xf32> to vector<16x16xf32>
    %61 = vector.shape_cast %60 : vector<16x16xf32> to vector<1x16x16xf32>
    %62 = arith.addf %58, %61 : vector<1x16x16xf32>
    %cst_30 = arith.constant dense<0xFF800000> : vector<1x16xf32>
    %63 = vector.multi_reduction <maximumf>, %62, %cst_30 [2] : vector<1x16x16xf32> to vector<1x16xf32>
    %64 = vector.shape_cast %63 : vector<1x16xf32> to vector<1x16x1xf32>
    %65 = vector.broadcast %64 : vector<1x16x1xf32> to vector<1x16x16xf32>
    %66 = arith.subf %62, %65 : vector<1x16x16xf32>
    %67 = math.exp %66 : vector<1x16x16xf32>
    %cst_31 = arith.constant dense<0.000000e+00> : vector<1x16xf32>
    %68 = vector.multi_reduction <add>, %67, %cst_31 [2] : vector<1x16x16xf32> to vector<1x16xf32>
    %69 = vector.shape_cast %68 : vector<1x16xf32> to vector<1x16x1xf32>
    %70 = tpu.reciprocal %69 {approx = true} : vector<1x16x1xf32> -> vector<1x16x1xf32>
    %71 = vector.broadcast %70 : vector<1x16x1xf32> to vector<1x16x16xf32>
    %72 = arith.mulf %67, %71 : vector<1x16x16xf32>
    %73 = arith.truncf %72 : vector<1x16x16xf32> to vector<1x16x16xbf16>
    "tpu.trace_start"() <{level = 10 : i32, message = "bnm,bmd->bnd"}> : () -> ()
    %cst_32 = arith.constant dense<0.000000e+00> : vector<1x16x8xf32>
    %74 = tpu.matmul %73, %57, %cst_32 {dimension_numbers = #tpu.dot_dimension_numbers<[2], [1], [1], [2], [0, 0, 0, 1, 1, 2], [0], [0]>} : vector<1x16x16xbf16>, vector<1x16x8xbf16>, vector<1x16x8xf32> -> vector<1x16x8xf32>
    "tpu.trace_stop"() : () -> ()
    %75 = arith.truncf %74 : vector<1x16x8xf32> to vector<1x16x8xbf16>
    %c0_33 = arith.constant 0 : index
    %c0_34 = arith.constant 0 : index
    %c16 = arith.constant 16 : index
    %76 = vector.load %arg8[%c0_33, %c0_34, %c16] : memref<1x16x128xbf16, #tpu.memory_space<vmem>>, vector<1x16x8xbf16>
    tpu.vector_store %arg8[%c0_33, %c0_34, %c16], %75 {strides = array<i32>} : memref<1x16x128xbf16, #tpu.memory_space<vmem>>, vector<1x16x8xbf16>,
    %77 = vector.extract_strided_slice %10 {offsets = [0, 0, 24], sizes = [1, 16, 8], strides = [1, 1, 1]} : vector<1x16x384xbf16> to vector<1x16x8xbf16>
    %78 = vector.extract_strided_slice %10 {offsets = [0, 0, 152], sizes = [1, 16, 8], strides = [1, 1, 1]} : vector<1x16x384xbf16> to vector<1x16x8xbf16>
    %79 = vector.extract_strided_slice %10 {offsets = [0, 0, 280], sizes = [1, 16, 8], strides = [1, 1, 1]} : vector<1x16x384xbf16> to vector<1x16x8xbf16>
    "tpu.trace_start"() <{level = 10 : i32, message = "bnd,bmd->bnm"}> : () -> ()
    %cst_35 = arith.constant dense<0.000000e+00> : vector<1x16x16xf32>
    %80 = tpu.matmul %77, %78, %cst_35 {dimension_numbers = #tpu.dot_dimension_numbers<[2], [2], [1], [1], [0, 0, 0, 1, 1, 1], [0], [0]>} : vector<1x16x8xbf16>, vector<1x16x8xbf16>, vector<1x16x16xf32> -> vector<1x16x16xf32>
    "tpu.trace_stop"() : () -> ()
    %c3 = arith.constant 3 : index
    %c0_36 = arith.constant 0 : index
    %c0_37 = arith.constant 0 : index
    %81 = vector.load %arg4[%c3, %c0_36, %c0_37] : memref<4x16x16xf32, #tpu.memory_space<vmem>>, vector<1x16x16xf32>
    %82 = vector.shape_cast %81 : vector<1x16x16xf32> to vector<16x16xf32>
    %83 = vector.shape_cast %82 : vector<16x16xf32> to vector<1x16x16xf32>
    %84 = arith.addf %80, %83 : vector<1x16x16xf32>
    %cst_38 = arith.constant dense<0xFF800000> : vector<1x16xf32>
    %85 = vector.multi_reduction <maximumf>, %84, %cst_38 [2] : vector<1x16x16xf32> to vector<1x16xf32>
    %86 = vector.shape_cast %85 : vector<1x16xf32> to vector<1x16x1xf32>
    %87 = vector.broadcast %86 : vector<1x16x1xf32> to vector<1x16x16xf32>
    %88 = arith.subf %84, %87 : vector<1x16x16xf32>
    %89 = math.exp %88 : vector<1x16x16xf32>
    %cst_39 = arith.constant dense<0.000000e+00> : vector<1x16xf32>
    %90 = vector.multi_reduction <add>, %89, %cst_39 [2] : vector<1x16x16xf32> to vector<1x16xf32>
    %91 = vector.shape_cast %90 : vector<1x16xf32> to vector<1x16x1xf32>
    %92 = tpu.reciprocal %91 {approx = true} : vector<1x16x1xf32> -> vector<1x16x1xf32>
    %93 = vector.broadcast %92 : vector<1x16x1xf32> to vector<1x16x16xf32>
    %94 = arith.mulf %89, %93 : vector<1x16x16xf32>
    %95 = arith.truncf %94 : vector<1x16x16xf32> to vector<1x16x16xbf16>
    "tpu.trace_start"() <{level = 10 : i32, message = "bnm,bmd->bnd"}> : () -> ()
    %cst_40 = arith.constant dense<0.000000e+00> : vector<1x16x8xf32>
    %96 = tpu.matmul %95, %79, %cst_40 {dimension_numbers = #tpu.dot_dimension_numbers<[2], [1], [1], [2], [0, 0, 0, 1, 1, 2], [0], [0]>} : vector<1x16x16xbf16>, vector<1x16x8xbf16>, vector<1x16x8xf32> -> vector<1x16x8xf32>
    "tpu.trace_stop"() : () -> ()
    %97 = arith.truncf %96 : vector<1x16x8xf32> to vector<1x16x8xbf16>
    %c0_41 = arith.constant 0 : index
    %c0_42 = arith.constant 0 : index
    %c24 = arith.constant 24 : index
    %98 = vector.load %arg8[%c0_41, %c0_42, %c24] : memref<1x16x128xbf16, #tpu.memory_space<vmem>>, vector<1x16x8xbf16>
    tpu.vector_store %arg8[%c0_41, %c0_42, %c24], %97 {strides = array<i32>} : memref<1x16x128xbf16, #tpu.memory_space<vmem>>, vector<1x16x8xbf16>,
    %c0_43 = arith.constant 0 : index
    %c0_44 = arith.constant 0 : index
    %c0_45 = arith.constant 0 : index
    %99 = vector.load %arg8[%c0_43, %c0_44, %c0_45] : memref<1x16x128xbf16, #tpu.memory_space<vmem>>, vector<1x16x128xbf16>
    %100 = vector.shape_cast %99 : vector<1x16x128xbf16> to vector<16x128xbf16>
    %c0_46 = arith.constant 0 : index
    %c0_47 = arith.constant 0 : index
    %101 = vector.load %arg5[%c0_46, %c0_47] : memref<128x128xbf16, #tpu.memory_space<vmem>>, vector<128x128xbf16>
    %cst_48 = arith.constant dense<0.000000e+00> : vector<16x128xf32>
    %102 = tpu.matmul %100, %101, %cst_48 {dimension_numbers = #tpu.dot_dimension_numbers<[1], [0], [0], [1], [0, 0, 1, 1], [], []>} : vector<16x128xbf16>, vector<128x128xbf16>, vector<16x128xf32> -> vector<16x128xf32>
    %c0_49 = arith.constant 0 : index
    %c0_50 = arith.constant 0 : index
    %103 = vector.load %arg6[%c0_49, %c0_50] : memref<1x128xf32, #tpu.memory_space<vmem>>, vector<1x128xf32>
    %104 = vector.broadcast %103 : vector<1x128xf32> to vector<16x128xf32>
    %105 = arith.addf %102, %104 : vector<16x128xf32>
    %106 = vector.shape_cast %105 : vector<16x128xf32> to vector<1x16x128xf32>
    %c0_51 = arith.constant 0 : index
    %c0_52 = arith.constant 0 : index
    %c0_53 = arith.constant 0 : index
    %107 = vector.load %arg7[%c0_51, %c0_52, %c0_53] : memref<1x16x128xf32, #tpu.memory_space<vmem>>, vector<1x16x128xf32>
    tpu.vector_store %arg7[%c0_51, %c0_52, %c0_53], %106 {strides = array<i32>} : memref<1x16x128xf32, #tpu.memory_space<vmem>>, vector<1x16x128xf32>,
    return
  }
  func.func @transform_0(%arg0: i32) -> (i32, i32, i32) {
    %c0_i32 = arith.constant 0 : i32
    %c0_i32_0 = arith.constant 0 : i32
    %c0_i32_1 = arith.constant 0 : i32
    return %arg0, %c0_i32, %c0_i32_0 : i32, i32, i32
  }
  func.func @transform_1(%arg0: i32) -> (i32, i32) {
    %c0_i32 = arith.constant 0 : i32
    %c0_i32_0 = arith.constant 0 : i32
    %c0_i32_1 = arith.constant 0 : i32
    return %c0_i32, %c0_i32_0 : i32, i32
  }
  func.func @transform_2(%arg0: i32) -> (i32, i32) {
    %c0_i32 = arith.constant 0 : i32
    %c0_i32_0 = arith.constant 0 : i32
    %c0_i32_1 = arith.constant 0 : i32
    return %c0_i32, %c0_i32_0 : i32, i32
  }
  func.func @transform_3(%arg0: i32) -> (i32, i32, i32) {
    %c0_i32 = arith.constant 0 : i32
    %c0_i32_0 = arith.constant 0 : i32
    %c0_i32_1 = arith.constant 0 : i32
    %c0_i32_2 = arith.constant 0 : i32
    return %c0_i32, %c0_i32_0, %c0_i32_1 : i32, i32, i32
  }
  func.func @transform_4(%arg0: i32) -> (i32, i32) {
    %c0_i32 = arith.constant 0 : i32
    %c0_i32_0 = arith.constant 0 : i32
    %c0_i32_1 = arith.constant 0 : i32
    return %c0_i32, %c0_i32_0 : i32, i32
  }
  func.func @transform_5(%arg0: i32) -> (i32, i32) {
    %c0_i32 = arith.constant 0 : i32
    %c0_i32_0 = arith.constant 0 : i32
    %c0_i32_1 = arith.constant 0 : i32
    return %c0_i32, %c0_i32_0 : i32, i32
  }
  func.func @transform_6(%arg0: i32) -> (i32, i32, i32) {
    %c0_i32 = arith.constant 0 : i32
    %c0_i32_0 = arith.constant 0 : i32
    %c0_i32_1 = arith.constant 0 : i32
    return %arg0, %c0_i32, %c0_i32_0 : i32, i32, i32
  }
}

</mosaic_0001>

<bundles_post_ra>
// kernel: tpu_custom_call.1
= control target key start
LH: loop header
LB: loop body
LE: loop exit
PB: predicated region body
PF: predicated region fallthrough
CT: control target
= control target key end

     0   :  { %11 = vsyncpa [#allocation4], 0  ;;  %s2296_s0 = inlined_call_operand.hbm [shape: bf16[2,16,128], index: 0, kind: input, shape index: {}]   ;;  %s2297_s1 = inlined_call_operand.hbm [shape: bf16[128,384], index: 1, kind: input, shape index: {}]   ;;  %s2298_s2 = inlined_call_operand.vmem [shape: f32[1,384], index: 2, kind: input, shape index: {}]   ;;  %s2299_s3 = inlined_call_operand.hbm [shape: f32[4,16,16], index: 3, kind: input, shape index: {}]   ;;  %s2300_s4 = inlined_call_operand.hbm [shape: bf16[128,128], index: 4, kind: input, shape index: {}]   ;;  %s2301_s5 = inlined_call_operand.vmem [shape: f32[1,128], index: 5, kind: input, shape index: {}]   ;;  %s2302_s6 = inlined_call_operand.hbm [shape: f32[2,16,128], index: 6, kind: output, shape index: {}]  }
   0x1   :  { %13 = vsyncpa [#allocation4 + $0x1], 0 }
   0x2   :  { %14 = vsyncpa [#allocation7], 0 }
   0x3   :  { %15 = vsyncpa [#allocation10], 0 }
   0x4   :  { %16 = vsyncpa [#allocation5], 0 }
   0x5   :  { %18 = vsyncpa [#allocation5 + $0x1], 0  ;;  %s1934_s21 = smov 0   ;;  %s1936_s22 = smov 0  }
   0x6   :  { %s1938_s23 = smov 0   ;;  %s1940_s24 = smov 0  }
   0x7 LB: > { %s1955_s25 = sadd.s32 4294967295, %s1876_s24   ;;  %s1336_s26 = sadd.s32 4294967294, %s1876_s24   ;;  %s1876_s24 = sphi %s1940_s24, %s2325_s24   ;;  %s1872_s23 = sphi %s1938_s23, %s2324_s23   ;;  %s1868_s22 = sphi %s1936_s22, %s2323_s22   ;;  %s1864_s21 = sphi %s1934_s21, %s2322_s21  }
   0x8   : > { %p44_p0 = scmp.ne.s32.totalorder %s1868_s22, %s1864_s21  ;;  %p2303_p1 = scmp.eq.s32.totalorder %s1955_s25, 0 }
   0x9   : > { %p179_p3 = scmp.eq.s32.totalorder %s1336_s26, 1  ;;  %p1337_p5 = scmp.ge.s32.totalorder %s1876_s24, 1 }
   0xa   : > { %p1964_p4 = por %p2303_p1, %p44_p0  ;;  %p186_p7 = scmp.lt.s32.totalorder %s1876_s24, 3 }
   0xb   : > { %p1969_p6 = por %p179_p3, %p44_p0  ;;  %s1878_s30 = smov [#allocation6]  }
   0xc   : > { %s2306_s27 = scalar_select %p1964_p4, 1, 0 }
   0xd   : > { %s2307_s28 = scalar_select %p1969_p6, 1, 0 }
   0xe   : > { %p1974_p8 = pnand %p1337_p5, %p186_p7  ;;  %s198_s7 = sshll.u32 %s1878_s30, 4  ;;  %s1978_s7 = int_to_ptr.vmem [resolvable:$true] %s198_s7 }
   0xf   : > { %s1879_s9 = smov [#allocation8]   ;;  %s1688_s13 = scalar_lea.hbm %s2297_s1, 3072 }
  0x10   : > { %s2308_s29 = scalar_select %p1974_p8, 1, 0 }
  0x11   : > { %p1538_p9 = pneg %p1974_p8  ;;  %s214_s10 = sshll.u32 %s1879_s9, 4  ;;  %s1989_s10 = int_to_ptr.vmem [resolvable:$true] %s214_s10 }
  0x12   : > { %p1689_p12 = scmp.ne.s32.totalorder %s2297_s1, %s1688_s13  ;;  %p1695_p5 = scmp.lt.u32.totalorder %s1688_s13, %s2297_s1 }
  0x13   : > { %p1985_p11 = pnand %p1538_p9, %p2303_p1 }
  0x15   : > { %p1999_p13 = pneg %p1985_p11 }
  0x17   : > { %p1691_p0 = pnand %p1999_p13, %p1689_p12 }
  0x19   : > { %p1692_p3 = pneg %p1691_p0 }
  0x1b   : > { %p1697_p7 = pnand %p1695_p5, %p1692_p3 }
  0x1d   : > { %1700 = shalt.err (!%p1697_p7)
}
  0x1e   : > { %s1701_s19 = scalar_lea.vmem %s1978_s7, 3072  ;;  %p1709_p2 = scmp.lt.s32.totalorder %s1978_s7, %s1978_s7 }
  0x1f   : > { %p1702_p9 = scmp.ne.s32.totalorder %s1978_s7, %s1701_s19  ;;  %p1710_p6 = scmp.lt.s32.totalorder %s1701_s19, %s1701_s19 }
  0x21   : > { %p1704_p10 = pnand %p1702_p9, %p1999_p13  ;;  %p1711_p12 = por %p1710_p6, %p1709_p2 }
  0x23   : > { %p1705_p1 = pneg %p1704_p10 }
  0x25   : > { %p1712_p0 = pnand %p1711_p12, %p1705_p1 }
  0x27   : > { %1715 = shalt.err (!%p1712_p0)
}
  0x28   : > { %s1880_s20 = smov 192   ;;  %s1881_s26 = smov 12  }
  0x29   : > { %1541 = dma.hbm_to_vmem [thread:$0]  (!%p1985_p11), %s2297_s1, 3072, %s1978_s7, [#allocation7], %s1880_s20, %s1880_s20, %s1881_s26  }
  0x2a   : > { %s1716_s13 = scalar_lea.hbm %s2299_s3, 1024 }
  0x2b   : > { %p1717_p2 = scmp.ne.s32.totalorder %s2299_s3, %s1716_s13  ;;  %p1723_p10 = scmp.lt.u32.totalorder %s1716_s13, %s2299_s3 }
  0x2d   : > { %p1719_p1 = pnand %p1717_p2, %p1999_p13 }
  0x2f   : > { %p1720_p6 = pneg %p1719_p1 }
  0x31   : > { %p1725_p3 = pnand %p1723_p10, %p1720_p6 }
  0x33   : > { %1728 = shalt.err (!%p1725_p3)
}
  0x34   : > { %s1729_s7 = scalar_lea.vmem %s1989_s10, 1024  ;;  %p1737_p12 = scmp.lt.s32.totalorder %s1989_s10, %s1989_s10 }
  0x35   : > { %p1730_p5 = scmp.ne.s32.totalorder %s1989_s10, %s1729_s7  ;;  %p1738_p0 = scmp.lt.s32.totalorder %s1729_s7, %s1729_s7 }
  0x37   : > { %p1732_p7 = pnand %p1730_p5, %p1999_p13  ;;  %p1739_p2 = por %p1738_p0, %p1737_p12 }
  0x39   : > { %p1733_p9 = pneg %p1732_p7 }
  0x3b   : > { %p1740_p1 = pnand %p1739_p2, %p1733_p9 }
  0x3d   : > { %1743 = shalt.err (!%p1740_p1)
}
  0x3e   : > { %s1882_s19 = smov 128   ;;  %s1883_s20 = smov 8  }
  0x3f   : > { %1544 = dma.hbm_to_vmem [thread:$0]  (!%p1985_p11), %s2299_s3, 1024, %s1989_s10, [#allocation7], %s1882_s19, %s1882_s19, %s1883_s20  }
  0x40   : > { %s1884_s9 = smov [#allocation9]   ;;  %s1744_s14 = scalar_lea.hbm %s2300_s4, 1024 }
  0x41   : > { %s227_s11 = sshll.u32 %s1884_s9, 4  ;;  %p1745_p6 = scmp.ne.s32.totalorder %s2300_s4, %s1744_s14  ;;  %s228_s11 = int_to_ptr.vmem [resolvable:$true] %s227_s11 }
  0x42   : > { %p1751_p5 = scmp.lt.u32.totalorder %s1744_s14, %s2300_s4 }
  0x43   : > { %p1747_p10 = pnand %p1745_p6, %p1999_p13 }
  0x45   : > { %p1748_p3 = pneg %p1747_p10 }
  0x47   : > { %p1753_p7 = pnand %p1751_p5, %p1748_p3 }
  0x49   : > { %1756 = shalt.err (!%p1753_p7)
}
  0x4a   : > { %s1757_s10 = scalar_lea.vmem %s228_s11, 1024  ;;  %p1765_p2 = scmp.lt.s32.totalorder %s228_s11, %s228_s11 }
  0x4b   : > { %p1758_p9 = scmp.ne.s32.totalorder %s228_s11, %s1757_s10  ;;  %p1766_p1 = scmp.lt.s32.totalorder %s1757_s10, %s1757_s10 }
  0x4d   : > { %p1760_p12 = pnand %p1758_p9, %p1999_p13  ;;  %p1767_p4 = por %p1766_p1, %p1765_p2 }
  0x4f   : > { %p1761_p0 = pneg %p1760_p12 }
  0x51   : > { %p1768_p8 = pnand %p1767_p4, %p1761_p0 }
  0x53   : > { %1771 = shalt.err (!%p1768_p8)
}
  0x54   : > { %s1885_s19 = smov 64   ;;  %s1886_s16 = smov 4  }
  0x55   : > { %1547 = dma.hbm_to_vmem [thread:$0]  (!%p1985_p11), %s2300_s4, 1024, %s228_s11, [#allocation10], %s1885_s19, %s1885_s19, %s1886_s16  }
  0x56   : > { %s2065_s30 = sadd.s32 1, %s1876_s24   ;;  %s31_s12 = sadd.s32 1, %s1872_s23 }
  0x57   : > { %s28_s9 = ssub.s32 %s1876_s24, %s2065_s30  ;;  %p38_p8 = scmp.ne.s32.totalorder %s1872_s23, %s1868_s22 }
  0x58   : > { %p29_p4 = scmp.eq.s32.totalorder %s28_s9, 0  ;;  %p39_p13 = scmp.eq.s32.totalorder %s1876_s24, 0 }
  0x59   : > { %p1559_p6 = scmp.lt.s32.totalorder %s1876_s24, 2  ;;  %p2311_p3 = scmp.eq.s32.totalorder %s1955_s25, 1 }
  0x5a   : > { %s2075_s13 = scalar_select %p29_p4, %s1872_s23, %s31_s12  }
  0x5b   : > { %p40_p10 = por %p39_p13, %p38_p8  ;;  %p2079_p5 = por %p2311_p3, %p38_p8 }
  0x5c   : > { %s244_s14 = sand.u32 1, %s1872_s23   ;;  %s1398_s15 = sshll.u32 %s1876_s24, 7 }
  0x5d   : > { %s1342_s11 = sshll.u32 %s244_s14, 3  ;;  %s2088_s7 = scalar_lea.hbm %s2296_s0, %s1398_s15 }
  0x5e   : > { %s248_s10 = scalar_lea.vmem [#allocation3], %s1342_s11  ;;  %p2090_p11 = pnand %p1559_p6, %p40_p10 }
  0x5f   : > { %s255_s20 = sshll.u32 %s248_s10, 4  ;;  %s2096_s9 = scalar_lea.sflag [#allocation4], %s244_s14  ;;  %s2094_s20 = int_to_ptr.vmem [resolvable:$true] %s255_s20 }
  0x60   : > { %s1772_s12 = scalar_lea.hbm %s2088_s7, 128  ;;  %p1774_p9 = pneg %p2090_p11 }
  0x61   : > { %p1773_p7 = scmp.ne.s32.totalorder %s2088_s7, %s1772_s12  ;;  %s1777_s17 = scalar_lea.hbm %s2296_s0, 256 }
  0x62   : > { %p1778_p2 = scmp.lt.u32.totalorder %s2088_s7, %s2296_s0  ;;  %p1779_p1 = scmp.lt.u32.totalorder %s1777_s17, %s1772_s12 }
  0x63   : > { %p1775_p12 = pnand %p1774_p9, %p1773_p7  ;;  %p1781_p8 = scmp.lt.u32.totalorder %s1772_s12, %s2088_s7 }
  0x64   : > { %p1780_p4 = por %p1779_p1, %p1778_p2 }
  0x65   : > { %p1776_p0 = pneg %p1775_p12 }
  0x66   : > { %p1782_p13 = por %p1781_p8, %p1780_p4 }
  0x68   : > { %p1783_p6 = pnand %p1782_p13, %p1776_p0 }
  0x6a   : > { %1786 = shalt.err (!%p1783_p6)
}
  0x6b   : > { %s1787_s14 = scalar_lea.vmem %s2094_s20, 128  ;;  %s1887_s15 = smov [#allocation3]  }
  0x6c   : > { %p1788_p10 = scmp.ne.s32.totalorder %s2094_s20, %s1787_s14  ;;  %s1792_s11 = sshll.u32 %s1887_s15, 4  ;;  %s1793_s11 = int_to_ptr.vmem [resolvable:$false] %s1792_s11 }
  0x6d   : > { %s1794_s18 = scalar_lea.vmem %s1793_s11, 256  ;;  %p1795_p12 = scmp.lt.s32.totalorder %s2094_s20, %s1793_s11 }
  0x6e   : > { %p1790_p3 = pnand %p1788_p10, %p1774_p9  ;;  %p1796_p2 = scmp.lt.s32.totalorder %s1794_s18, %s1787_s14 }
  0x70   : > { %p1791_p7 = pneg %p1790_p3  ;;  %p1797_p1 = por %p1796_p2, %p1795_p12 }
  0x72   : > { %p1798_p4 = pnand %p1797_p1, %p1791_p7 }
  0x74   : > { %1801 = shalt.err (!%p1798_p4)
}
  0x75   : > { %1551 = dma.hbm_to_vmem [thread:$0]  (!%p2090_p11), %s2088_s7, 128, %s2094_s20, %s2096_s9, %s1885_s19, %s1885_s19, %s1886_s16  }
  0x76   : > { %p2314_p9 = scmp.ne.s32.totalorder %s2308_s29, 0 }
  0x77   : > { %s2130_s12 = sand.u32 (!%p2314_p9), 1, %s1868_s22   ;;  %p2315_p0 = scmp.ne.s32.totalorder (!%p2314_p9), %s2306_s27, 0 }
  0x78   : > { %267 = sbr.rel (%p2314_p9) target bundleno = 2071 (0x817), region = 44  ;;  %s1346_s17 = sshll.u32 (!%p2314_p9), %s2130_s12, 3 }
  0x79   : > { %s270_s10 = scalar_lea.sflag (!%p2314_p9), [#allocation4], %s2130_s12  ;;  %s2134_s14 = scalar_lea.vmem (!%p2314_p9), [#allocation3], %s1346_s17 }
  0x7f   : > { %1847 = dma.done.wait (%p2315_p0), %s270_s10, 128  }
  0x80   : > { %1849 = vsyncadd (%p2315_p0), %s270_s10, 4294967168  ;;  %p2316_p11 = scmp.eq.s32.totalorder %s1955_s25, 0 }
  0x82   : > { %1851 = dma.done.wait (%p2316_p11), [#allocation7], 4096   ;;  %p2317_p8 = pmov %p2316_p11 }
  0x84   : > { %1853 = vsyncadd (%p2317_p8), [#allocation7], 4294963200  ;;  %p2318_p13 = pmov %p2317_p8 }
  0x85   : > { %p2319_p6 = pmov %p2317_p8 }
  0x86   : > { %1855 = dma.done.wait (%p2318_p13), [#allocation10], 1024  }
  0x87   : > { %1857 = vsyncadd (%p2319_p6), [#allocation10], 4294966272  ;;  %vm315_vm0 = vcmask 1047808   ;;  %v1888_v0 = vmov 0   ;;  %v1889_v1 = vmov 0.0   ;;  %v1639_v23 = vld [vmem:[%s2134_s14] sm:$0xff]   ;;  %v353_v27 = vlaneseq }
  0x88   : > { %316 = vst.msk [vmem:[#allocation2] sm:$0xff] %vm315_vm0, %v1888_v0  ;;  %534 = vmatprep.mubr.bf16.mxu0 %v1888_v0  ;;  %1434 = vmatprep.subr.bf16.mxu1 %v1889_v1  ;;  %v1615_v2 = vld [vmem:[#allocation6 + $0x4] ss:$12 sps:$4 sm:$0xff]   ;;  %v1617_v3 = vld [vmem:[#allocation6] ss:$12 sps:$4 sm:$0xff]   ;;  %vm1890_vm1 = vmmov 0  }
  0x89   : > { %502 = vmatprep.subr.bf16.mxu0 %v1615_v2  ;;  %v1618_v4 = vld [vmem:[#allocation6 + $0x1c] ss:$12 sps:$4 sm:$0xff]   ;;  %v1620_v5 = vld [vmem:[#allocation6 + $0x18] ss:$12 sps:$4 sm:$0xff]   ;;  %v1621_v6 = vld [vmem:[#allocation6 + $0x34] ss:$12 sps:$4 sm:$0xff]   ;;  %1450 = vmatprep.mubr.msk.bf16.mxu1 %vm1890_vm1, %v1889_v1 }
  0x8a   : > { %503 = vmatpush1.bf16.msra.mxu0 %v1617_v3  ;;  %v1623_v7 = vld [vmem:[#allocation6 + $0x30] ss:$12 sps:$4 sm:$0xff]   ;;  %v1624_v8 = vld [vmem:[#allocation6 + $0x4c] ss:$12 sps:$4 sm:$0xff]   ;;  %v1626_v9 = vld [vmem:[#allocation6 + $0x48] ss:$12 sps:$4 sm:$0xff]  }
  0x8b   : > { %504 = vmatprep.subr.bf16.mxu0 %v1618_v4  ;;  %v1627_v10 = vld [vmem:[#allocation6 + $0x64] ss:$12 sps:$4 sm:$0xff]   ;;  %v1640_v11 = vld [vmem:[#allocation6 + $0x8] ss:$12 sps:$4 sm:$0xff]   ;;  %v1641_v12 = vld [vmem:[#allocation6 + $0x20] ss:$12 sps:$4 sm:$0xff]  }
  0x8c   : > { %1435 = vmatpush3.bf16.msra.mxu1 %v1640_v11  ;;  %v1629_v13 = vld [vmem:[#allocation6 + $0x60] ss:$12 sps:$4 sm:$0xff]   ;;  %v1630_v14 = vld [vmem:[#allocation6 + $0x7c] ss:$12 sps:$4 sm:$0xff]   ;;  %v1632_v15 = vld [vmem:[#allocation6 + $0x78] ss:$12 sps:$4 sm:$0xff]  }
  0x8d   : > { %1436 = vmatprep.subr.bf16.mxu1 %v1889_v1  ;;  %v1633_v16 = vld [vmem:[#allocation6 + $0x94] ss:$12 sps:$4 sm:$0xff]   ;;  %v1642_v17 = vld [vmem:[#allocation6 + $0x38] ss:$12 sps:$4 sm:$0xff]   ;;  %v1643_v18 = vld [vmem:[#allocation6 + $0x50] ss:$12 sps:$4 sm:$0xff]  }
  0x8e   : > { %505 = vmatpush1.bf16.msra.mxu0 %v1620_v5  ;;  %v1635_v19 = vld [vmem:[#allocation6 + $0x90] ss:$12 sps:$4 sm:$0xff]   ;;  %v1636_v20 = vld [vmem:[#allocation6 + $0xac] ss:$12 sps:$4 sm:$0xff]   ;;  %v1644_v21 = vld [vmem:[#allocation6 + $0x68] ss:$12 sps:$4 sm:$0xff]  }
  0x8f   : > { %506 = vmatprep.subr.bf16.mxu0 %v1621_v6  ;;  %v1638_v22 = vld [vmem:[#allocation6 + $0xa8] ss:$12 sps:$4 sm:$0xff]   ;;  %v1645_v24 = vld [vmem:[#allocation6 + $0x80] ss:$12 sps:$4 sm:$0xff]   ;;  %v1646_v25 = vld [vmem:[#allocation6 + $0x98] ss:$12 sps:$4 sm:$0xff]  }
  0x90   : > { %1437 = vmatpush3.bf16.msra.mxu1 %v1641_v12  ;;  %v1647_v26 = vld [vmem:[#allocation6 + $0xb0] ss:$12 sps:$4 sm:$0xff]   ;;  %v354_v28 = vshrl.u32 %v353_v27, 7  ;;  %v351_v30 = vld [vmem:[%s2298_s2] sm:$0x7]  ;;  %vm591_vm2 = vcmask 64512  }
  0x91   : > { %1438 = vmatprep.subr.bf16.mxu1 %v1889_v1  ;;  %v589_v54 = vld [vmem:[#allocation8] sm:$0xff]  ;;  %v590_v56 = vld [vmem:[#allocation8 + $0x8] sm:$0xff]  ;;  %vm639_vm3 = vcmask 130048   ;;  %s1891_s19 = smov 120   ;;  %s1892_s16 = smov 104   ;;  %vm841_vm4 = vcmask 130112  }
  0x92   : > { %507 = vmatpush1.bf16.msra.mxu0 %v1623_v7  ;;  %v355_v29 = vsub.s32 0, %v354_v28  ;;  %v359_v31 = vsub.s32 1, %v354_v28  ;;  %v363_v45 = vsub.s32 2, %v354_v28  ;;  %s1893_s7 = smov 112   ;;  %s1894_s20 = smov 8   ;;  %vm972_vm5 = vcmask 195712  }
  0x93   : > { %508 = vmatprep.subr.bf16.mxu0 %v1624_v8  ;;  %s1895_s26 = smov 16   ;;  %s1896_s9 = smov 24   ;;  %vm1103_vm6 = vcmask 261312  }
  0x94   : > { %1439 = vmatpush3.bf16.msra.mxu1 %v1642_v17  ;;  %v356_v32 = vrot.slane %v351_v30, %v355_v29  ;;  %v360_v34 = vrot.slane %v351_v30, %v359_v31  ;;  %v364_v46 = vrot.slane %v351_v30, %v363_v45  ;;  %v976_v45 = vld [vmem:[#allocation8 + $0x38] sm:$0xff]  ;;  %s1350_s15 = sshll.u32 %s2130_s12, 4  ;;  %s1399_s14 = sshll.u32 %s1955_s25, 8 }
  0x95   : > { %1440 = vmatprep.subr.bf16.mxu1 %v1889_v1  ;;  %s313_s17 = scalar_lea.vmem [#allocation11], %s1350_s15  ;;  %s1897_s25 = smov [#allocation11]  }
  0x96   : > { %509 = vmatpush1.bf16.msra.mxu0 %v1626_v9  ;;  %s1234_s10 = sshll.u32 %s313_s17, 4  ;;  %s2246_s10 = int_to_ptr.vmem [resolvable:$true] %s1234_s10 }
  0x97   : > { %510 = vmatprep.subr.bf16.mxu0 %v1627_v10 }
  0x98   : > { %1441 = vmatpush3.bf16.msra.mxu1 %v1643_v18 }
  0x99   : > { %1442 = vmatprep.subr.bf16.mxu1 %v1889_v1 }
  0x9a   : > { %511 = vmatpush1.bf16.msra.mxu0 %v1629_v13 }
  0x9b   : > { %512 = vmatprep.subr.bf16.mxu0 %v1630_v14 }
  0x9c   : > { %1443 = vmatpush3.bf16.msra.mxu1 %v1644_v21 }
  0x9d   : > { %1444 = vmatprep.subr.bf16.mxu1 %v1889_v1 }
  0x9e   : > { %513 = vmatpush1.bf16.msra.mxu0 %v1632_v15 }
  0x9f   : > { %514 = vmatprep.subr.bf16.mxu0 %v1633_v16 }
  0xa0   : > { %1445 = vmatpush3.bf16.msra.mxu1 %v1645_v24 }
  0xa1   : > { %1446 = vmatprep.subr.bf16.mxu1 %v1889_v1 }
  0xa2   : > { %515 = vmatpush1.bf16.msra.mxu0 %v1635_v19 }
  0xa3   : > { %516 = vmatprep.subr.bf16.mxu0 %v1636_v20 }
  0xa4   : > { %1447 = vmatpush3.bf16.msra.mxu1 %v1646_v25 }
  0xa5   : > { %1448 = vmatprep.subr.bf16.mxu1 %v1889_v1 }
  0xa6   : > { %517 = vmatpush1.bf16.msra.mxu0 %v1638_v22 }
  0xa7   : > { %1478 = vmatprep.subr.bf16.mxu0 %v1889_v1 }
  0xa8   : > { %1449 = vmatpush3.bf16.msra.mxu1 %v1647_v26 }
  0xa9   : > { %535 = vmatmul.mubr.bf16.vlgmr.msra.gmra.mrb[0].mxu0 %v1639_v23  ;;  %1454 = vmatprep.subr.bf16.mxu1 %v1889_v1 }
  0xaa   : > { %1480 = vmatprep.mubr.msk.bf16.mxu0 %vm1890_vm1, %v1889_v1 }
  0xab   : > { %1451 = vmatmul.mubr.bf16.vlgmr.msra.gmra.mrb[0].mxu1 %v1639_v23 }
  0xac   : > { %1456 = vmatprep.mubr.msk.bf16.mxu1 %vm1890_vm1, %v1889_v1 }
 0x17c   : > { %v536_v33 = vpop.f32.mrb[0].mxu0 }
 0x17d   : > { %v538_v35 = vpop.f32.mrb[1].mxu0  ;;  %v537_v37 = vadd.f32 %v536_v33, %v356_v32 }
 0x17e   : > { %v540_v36 = vpop.f32.mrb[2].mxu0  ;;  %v539_v40 = vadd.f32 %v538_v35, %v360_v34  ;;  %v579_v47 = vpop.f32.mrb[0].mxu1 }
 0x17f   : > { %v541_v38 = vadd.f32 %v540_v36, %v356_v32  ;;  %v542_v39 = vpop.f32.mrb[3].mxu0  ;;  %v580_v48 = vadd.f32 %v579_v47, %v364_v46  ;;  %v1452_v49 = vpop.f32.mrb[1].mxu1  ;;  %v710_v36 = vld [vmem:[#allocation8 + $0x10] sm:$0xff] }
 0x180   : > { %v543_v41 = vadd.f32 %v542_v39, %v360_v34  ;;  %v582_v50 = vpop.f32.mrb[2].mxu1  ;;  %v711_v39 = vld [vmem:[#allocation8 + $0x18] sm:$0xff] }
 0x181   : > { %v586_v42 = vpack.c.bf16 %v541_v38, %v537_v37  ;;  %v583_v51 = vadd.f32 %v582_v50, %v364_v46  ;;  %v1453_v52 = vpop.f32.mrb[3].mxu1  ;;  %v844_v37 = vld [vmem:[#allocation8 + $0x20] sm:$0xff] }
 0x182   : > { %v587_v43 = vpack.c.bf16 %v543_v41, %v539_v40 }
 0x183   : > { %v2173_v53 = vpack.c.bf16 %v583_v51, %v580_v48  ;;  %v845_v51 = vld [vmem:[#allocation8 + $0x28] sm:$0xff] }
 0x184   : > { %v596_v44 = vsel %vm591_vm2, %v587_v43, 0 }
 0x185   : > { %1455 = vmatpush3.bf16.xpose.msra.mxu1 %v596_v44 }
 0x186   : > { %1460 = vmatprep.subr.bf16.mxu1 %v1889_v1 }
 0x18c   : > { %1457 = vmatmul.mubr.msk.bf16.vlgmr.msra.gmra.mrb[4].mxu1 %vm591_vm2, %v586_v42 }
 0x18d   : > { %1462 = vmatprep.mubr.msk.bf16.mxu1 %vm1890_vm1, %v1889_v1  ;;  %1461 = vmatpush3.bf16.msra.mxu1 %v2173_v53 }
 0x18e   : > { %1466 = vmatprep.subr.bf16.mxu1 %v1889_v1 }
 0x25f   : > { %v632_v55 = vpop.f32.mrb[4].mxu1 }
 0x260   : > { %v633_v57 = vadd.f32 %v632_v55, %v589_v54  ;;  %v1458_v58 = vpop.f32.mrb[5].mxu1 }
 0x261   : > { %v635_v59 = vpop.f32.mrb[6].mxu1  ;;  %v975_v58 = vld [vmem:[#allocation8 + $0x30] sm:$0xff] }
 0x262   : > { %v636_v60 = vadd.f32 %v635_v59, %v590_v56  ;;  %v1459_v61 = vpop.f32.mrb[7].mxu1  ;;  %v640_v62 = vsel %vm639_vm3, %v633_v57, -inf }
 0x263   : > { %641 = vmax.xlane.f32.xlu0 %v640_v62 }
 0x264   : > { %v643_v63 = vsel %vm639_vm3, %v636_v60, -inf }
 0x267   : > { %644 = vmax.xlane.f32.xlu0 %v643_v63 }
 0x27d   : > { %716 = vrot.lane.b32.xlu0 %v587_v43, %s1891_s19 }
 0x281   : > { %979 = vrot.lane.b32.xlu0 %v587_v43, %s1892_s16 }
 0x2f0   : > { %v642_v0 = vpop.xlane.xlu0 %641 }
 0x2f1   : > { %v646_v2 = vsub.f32 %v633_v57, %v642_v0 }
 0x2f3   : > { %v648_v3 = vmul.f32 1.442695, %v646_v2 }
 0x2f4   : > { %v645_v4 = vpop.xlane.xlu0 %644 }
 0x2f5   : > { %1656 = vpow2.f32 %v648_v3  ;;  %v647_v5 = vsub.f32 %v636_v60, %v645_v4 }
 0x2f7   : > { %v650_v6 = vmul.f32 1.442695, %v647_v5 }
 0x2f8   : > { %v717_v14 = vpop.permute.xlu0 %716 }
 0x2f9   : > { %1658 = vpow2.f32 %v650_v6  ;;  %v722_v23 = vsel %vm591_vm2, %v717_v14, 0 }
 0x2fc   : > { %v980_v21 = vpop.permute.xlu0 %979 }
 0x2fd   : > { %v985_v25 = vsel %vm591_vm2, %v980_v21, 0 }
 0x2ff   : > { %v1657_v7 = vpop.eup %1656 }
 0x300   : > { %v652_v8 = vsel %vm639_vm3, %v1657_v7, 0.0 }
 0x301   : > { %653 = vadd.xlane.f32.xlu1 %v652_v8 }
 0x303   : > { %v1659_v9 = vpop.eup %1658 }
 0x304   : > { %v655_v10 = vsel %vm639_vm3, %v1659_v9, 0.0 }
 0x305   : > { %656 = vadd.xlane.f32.xlu1 %v655_v10 }
 0x316   : > { %713 = vrot.lane.b32.xlu1 %v586_v42, %s1891_s19 }
 0x31a   : > { %848 = vrot.lane.b32.xlu1 %v587_v43, %s1893_s7 }
 0x31e   : > { %846 = vrot.lane.b32.xlu1 %v586_v42, %s1893_s7 }
 0x322   : > { %977 = vrot.lane.b32.xlu1 %v586_v42, %s1892_s16 }
 0x38e   : > { %v654_v11 = vpop.xlane.xlu1 %653 }
 0x38f   : > { %1660 = vrcp.f32 %v654_v11 }
 0x392   : > { %v657_v12 = vpop.xlane.xlu1 %656 }
 0x393   : > { %1662 = vrcp.f32 %v657_v12 }
 0x396   : > { %v714_v13 = vpop.permute.xlu1 %713 }
 0x399   : > { %v1661_v16 = vpop.eup %1660 }
 0x39a   : > { %v849_v15 = vpop.permute.xlu1 %848  ;;  %v660_v19 = vmul.f32 %v1661_v16, %v1657_v7 }
 0x39b   : > { %v854_v17 = vsel %vm591_vm2, %v849_v15, 0 }
 0x39c   : > { %1479 = vmatpush3.bf16.xpose.msra.mxu0 %v854_v17 }
 0x39d   : > { %v1663_v18 = vpop.eup %1662  ;;  %1490 = vmatprep.subr.bf16.mxu0 %v1889_v1 }
 0x39e   : > { %v661_v20 = vmul.f32 %v1663_v18, %v1659_v9  ;;  %v847_v24 = vpop.permute.xlu1 %846 }
 0x3a0   : > { %v662_v22 = vpack.c.bf16 %v661_v20, %v660_v19 }
 0x3a2   : > { %1463 = vmatmul.mubr.msk.bf16.vlgmr.msra.gmra.mrb[8].mxu1 %vm639_vm3, %v662_v22  ;;  %v978_v26 = vpop.permute.xlu1 %977 }
 0x3a3   : > { %1467 = vmatpush3.bf16.xpose.msra.mxu1 %v722_v23  ;;  %1481 = vmatmul.mubr.msk.bf16.vlgmr.msra.gmra.mrb[4].mxu0 %vm591_vm2, %v847_v24 }
 0x3a4   : > { %1491 = vmatpush3.bf16.xpose.msra.mxu0 %v985_v25  ;;  %1468 = vmatprep.mubr.msk.bf16.mxu1 %vm1890_vm1, %v1889_v1 }
 0x3a5   : > { %1492 = vmatprep.mubr.msk.bf16.mxu0 %vm1890_vm1, %v1889_v1  ;;  %1472 = vmatprep.subr.bf16.mxu1 %v1889_v1 }
 0x3a6   : > { %1502 = vmatprep.subr.bf16.mxu0 %v1889_v1 }
 0x3aa   : > { %1469 = vmatmul.mubr.msk.bf16.vlgmr.msra.gmra.mrb[12].mxu1 %vm591_vm2, %v714_v13 }
 0x3ab   : > { %1493 = vmatmul.mubr.msk.bf16.vlgmr.msra.gmra.mrb[8].mxu0 %vm591_vm2, %v978_v26  ;;  %1474 = vmatprep.mubr.msk.bf16.mxu1 %vm1890_vm1, %v1889_v1 }
 0x3ac   : > { %1518 = vmatprep.mubr.msk.bf16.mxu0 %vm1890_vm1, %v1889_v1 }
 0x475   : > { %v700_v27 = vpop.f32.mrb[8].mxu1 }
 0x476   : > { %v1464_v28 = vpop.f32.mrb[9].mxu1  ;;  %v890_v29 = vpop.f32.mrb[4].mxu0 }
 0x477   : > { %v703_v30 = vpop.f32.mrb[10].mxu1  ;;  %v1482_v31 = vpop.f32.mrb[5].mxu0  ;;  %v891_v46 = vadd.f32 %v890_v29, %v844_v37 }
 0x478   : > { %v707_v32 = vpack.c.bf16 %v703_v30, %v700_v27  ;;  %v1465_v33 = vpop.f32.mrb[11].mxu1  ;;  %v893_v34 = vpop.f32.mrb[6].mxu0 }
 0x479   : > { %v1483_v35 = vpop.f32.mrb[7].mxu0  ;;  %v894_v56 = vadd.f32 %v893_v34, %v845_v51  ;;  %v897_v57 = vsel %vm639_vm3, %v891_v46, -inf }
 0x47a   : > { %708 = vst.msk [vmem:[#allocation2] sm:$0xff] %vm591_vm2, %v707_v32 }
 0x47b   : > { %v900_v61 = vsel %vm639_vm3, %v894_v56, -inf }
 0x47d   : > { %v758_v38 = vpop.f32.mrb[12].mxu1 }
 0x47e   : > { %v759_v40 = vadd.f32 %v758_v38, %v710_v36  ;;  %v1470_v41 = vpop.f32.mrb[13].mxu1  ;;  %v1021_v42 = vpop.f32.mrb[8].mxu0 }
 0x47f   : > { %v761_v43 = vpop.f32.mrb[14].mxu1  ;;  %v1494_v44 = vpop.f32.mrb[9].mxu0  ;;  %v1022_v60 = vadd.f32 %v1021_v42, %v975_v58 }
 0x480   : > { %v762_v47 = vadd.f32 %v761_v43, %v711_v39  ;;  %v1471_v48 = vpop.f32.mrb[15].mxu1  ;;  %v1024_v49 = vpop.f32.mrb[10].mxu0  ;;  %v765_v50 = vsel %vm639_vm3, %v759_v40, -inf }
 0x481   : > { %v1495_v52 = vpop.f32.mrb[11].mxu0  ;;  %766 = vmax.xlane.f32.xlu0 %v765_v50  ;;  %v1025_v54 = vadd.f32 %v1024_v49, %v976_v45  ;;  %v1028_v62 = vsel %vm639_vm3, %v1022_v60, -inf }
 0x482   : > { %v768_v55 = vsel %vm639_vm3, %v762_v47, -inf }
 0x483   : > { %769 = vmax.xlane.f32.xlu1 %v768_v55  ;;  %v1031_v59 = vsel %vm639_vm3, %v1025_v54, -inf  ;;  %v1649_v55 = vld [vmem:[#allocation9 + $0x8] sm:$0xff]  }
 0x485   : > { %898 = vmax.xlane.f32.xlu0 %v897_v57  ;;  %v1651_v57 = vld [vmem:[#allocation9 + $0x18] sm:$0xff]  }
 0x487   : > { %1032 = vmax.xlane.f32.xlu1 %v1031_v59  ;;  %v1652_v59 = vld [vmem:[#allocation9 + $0x20] sm:$0xff]  }
 0x489   : > { %901 = vmax.xlane.f32.xlu0 %v900_v61 }
 0x48d   : > { %1029 = vmax.xlane.f32.xlu0 %v1028_v62  ;;  %v1653_v62 = vld [vmem:[#allocation9 + $0x28] sm:$0xff]  }
 0x50e   : > { %v767_v63 = vpop.xlane.xlu0 %766 }
 0x50f   : > { %v771_v9 = vsub.f32 %v759_v40, %v767_v63 }
 0x510   : > { %v770_v0 = vpop.xlane.xlu1 %769 }
 0x511   : > { %v772_v10 = vsub.f32 %v762_v47, %v770_v0  ;;  %v773_v15 = vmul.f32 1.442695, %v771_v9 }
 0x512   : > { %v899_v2 = vpop.xlane.xlu0 %898 }
 0x513   : > { %v903_v3 = vsub.f32 %v891_v46, %v899_v2  ;;  %v775_v16 = vmul.f32 1.442695, %v772_v10 }
 0x514   : > { %v1033_v4 = vpop.xlane.xlu1 %1032 }
 0x515   : > { %v905_v5 = vmul.f32 1.442695, %v903_v3  ;;  %v1035_v6 = vsub.f32 %v1025_v54, %v1033_v4  ;;  %v1648_v54 = vld [vmem:[#allocation9] sm:$0xff]   ;;  %v1654_v3 = vld [vmem:[#allocation9 + $0x30] sm:$0xff]  }
 0x516   : > { %v902_v7 = vpop.xlane.xlu0 %901  ;;  %1503 = vmatpush3.bf16.msra.mxu0 %v1648_v54 }
 0x517   : > { %1664 = vpow2.f32 %v905_v5  ;;  %v904_v8 = vsub.f32 %v894_v56, %v902_v7  ;;  %v1038_v11 = vmul.f32 1.442695, %v1035_v6  ;;  %1504 = vmatprep.subr.bf16.mxu0 %v1889_v1  ;;  %v1650_v56 = vld [vmem:[#allocation9 + $0x10] sm:$0xff]   ;;  %v1655_v6 = vld [vmem:[#allocation9 + $0x38] sm:$0xff]  }
 0x519   : > { %v907_v12 = vmul.f32 1.442695, %v904_v8 }
 0x51a   : > { %v1030_v13 = vpop.xlane.xlu0 %1029  ;;  %1505 = vmatpush3.bf16.msra.mxu0 %v1649_v55 }
 0x51b   : > { %1666 = vpow2.f32 %v907_v12  ;;  %v1034_v14 = vsub.f32 %v1022_v60, %v1030_v13  ;;  %1506 = vmatprep.subr.bf16.mxu0 %v1889_v1 }
 0x51c   : > { %1668 = vpow2.f32 %v1038_v11 }
 0x51d   : > { %v1036_v17 = vmul.f32 1.442695, %v1034_v14 }
 0x51e   : > { %1507 = vmatpush3.bf16.msra.mxu0 %v1650_v56 }
 0x51f   : > { %1670 = vpow2.f32 %v1036_v17  ;;  %1508 = vmatprep.subr.bf16.mxu0 %v1889_v1  ;;  %v1384_v17 = vld [vmem:[%s2301_s5] ss:$0 sm:$0xff] }
 0x520   : > { %1672 = vpow2.f32 %v773_v15 }
 0x521   : > { %v1665_v18 = vpop.eup %1664  ;;  %1674 = vpow2.f32 %v775_v16 }
 0x522   : > { %v909_v19 = vsel %vm639_vm3, %v1665_v18, 0.0  ;;  %1509 = vmatpush3.bf16.msra.mxu0 %v1651_v57 }
 0x523   : > { %910 = vadd.xlane.f32.xlu0 %v909_v19  ;;  %1510 = vmatprep.subr.bf16.mxu0 %v1889_v1 }
 0x525   : > { %v1667_v20 = vpop.eup %1666 }
 0x526   : > { %v912_v21 = vsel %vm639_vm3, %v1667_v20, 0.0  ;;  %v1669_v22 = vpop.eup %1668  ;;  %1511 = vmatpush3.bf16.msra.mxu0 %v1652_v59 }
 0x527   : > { %913 = vadd.xlane.f32.xlu1 %v912_v21  ;;  %v1043_v26 = vsel %vm639_vm3, %v1669_v22, 0.0  ;;  %1512 = vmatprep.subr.bf16.mxu0 %v1889_v1 }
 0x529   : > { %v1671_v23 = vpop.eup %1670 }
 0x52a   : > { %v1673_v24 = vpop.eup %1672  ;;  %v1040_v25 = vsel %vm639_vm3, %v1671_v23, 0.0  ;;  %1513 = vmatpush3.bf16.msra.mxu0 %v1653_v62 }
 0x52b   : > { %v1675_v27 = vpop.eup %1674  ;;  %1041 = vadd.xlane.f32.xlu0 %v1040_v25  ;;  %1044 = vadd.xlane.f32.xlu1 %v1043_v26  ;;  %v777_v28 = vsel %vm639_vm3, %v1673_v24, 0.0 }
 0x52c   : > { %v780_v29 = vsel %vm639_vm3, %v1675_v27, 0.0  ;;  %1514 = vmatprep.subr.bf16.mxu0 %v1889_v1 }
 0x52e   : > { %1515 = vmatpush3.bf16.msra.mxu0 %v1654_v3 }
 0x52f   : > { %778 = vadd.xlane.f32.xlu0 %v777_v28  ;;  %781 = vadd.xlane.f32.xlu1 %v780_v29 }
 0x530   : > { %1516 = vmatprep.subr.bf16.mxu0 %v1889_v1 }
 0x532   : > { %1517 = vmatpush3.bf16.msra.mxu0 %v1655_v6 }
 0x540   : > { %920 = vrot.lane.b32.xlu1 %v2173_v53, %s1893_s7  ;;  %s1802_s7 = scalar_lea.vmem %s2246_s10, 256 }
 0x541   : > { %p1803_p10 = scmp.ne.s32.totalorder %s2246_s10, %s1802_s7 }
 0x543   : > { %p1804_p3 = pnand %p1803_p10, %p2079_p5 }
 0x544   : > { %1051 = vrot.lane.b32.xlu1 %v2173_v53, %s1892_s16  ;;  %s1221_s16 = scalar_lea.sflag [#allocation5], %s2130_s12 }
 0x545   : > { %789 = vrot.lane.b32.xlu0 %v2173_v53, %s1891_s19  ;;  %s2251_s19 = scalar_lea.hbm %s2302_s6, %s1399_s14  ;;  %p1805_p7 = pneg %p1804_p3 }
 0x5b0   : > { %v911_v30 = vpop.xlane.xlu0 %910 }
 0x5b4   : > { %v914_v31 = vpop.xlane.xlu1 %913 }
 0x5b8   : > { %v1042_v32 = vpop.xlane.xlu0 %1041  ;;  %v1045_v33 = vpop.xlane.xlu1 %1044 }
 0x5bc   : > { %v779_v34 = vpop.xlane.xlu0 %778  ;;  %v782_v35 = vpop.xlane.xlu1 %781 }
 0x5bd   : > { %1676 = vrcp.f32 %v779_v34 }
 0x5be   : > { %1678 = vrcp.f32 %v782_v35 }
 0x5bf   : > { %1680 = vrcp.f32 %v914_v31 }
 0x5c0   : > { %v790_v36 = vpop.permute.xlu0 %789  ;;  %1682 = vrcp.f32 %v911_v30  ;;  %v921_v42 = vpop.permute.xlu1 %920 }
 0x5c1   : > { %1473 = vmatpush3.bf16.msra.mxu1 %v790_v36  ;;  %1684 = vrcp.f32 %v1042_v32 }
 0x5c2   : > { %1484 = vmatprep.subr.bf16.mxu1 %v1889_v1  ;;  %1686 = vrcp.f32 %v1045_v33 }
 0x5c4   : > { %v1052_v49 = vpop.permute.xlu1 %1051 }
 0x5c7   : > { %v1677_v37 = vpop.eup %1676 }
 0x5c8   : > { %v1679_v38 = vpop.eup %1678  ;;  %v785_v39 = vmul.f32 %v1677_v37, %v1673_v24 }
 0x5c9   : > { %v786_v40 = vmul.f32 %v1679_v38, %v1675_v27  ;;  %v1681_v41 = vpop.eup %1680 }
 0x5ca   : > { %v1683_v43 = vpop.eup %1682  ;;  %v918_v44 = vmul.f32 %v1681_v41, %v1667_v20 }
 0x5cb   : > { %v787_v53 = vpack.c.bf16 %v786_v40, %v785_v39  ;;  %v917_v45 = vmul.f32 %v1683_v43, %v1665_v18  ;;  %v1685_v46 = vpop.eup %1684 }
 0x5cc   : > { %v1687_v48 = vpop.eup %1686  ;;  %v1048_v50 = vmul.f32 %v1685_v46, %v1671_v23 }
 0x5cd   : > { %1475 = vmatmul.mubr.msk.bf16.vlgmr.msra.gmra.mrb[16].mxu1 %vm639_vm3, %v787_v53  ;;  %v919_v47 = vpack.c.bf16 %v918_v44, %v917_v45  ;;  %v1049_v51 = vmul.f32 %v1687_v48, %v1669_v22 }
 0x5ce   : > { %1485 = vmatpush3.bf16.msra.mxu1 %v921_v42  ;;  %1486 = vmatprep.mubr.msk.bf16.mxu1 %vm1890_vm1, %v1889_v1 }
 0x5cf   : > { %1496 = vmatprep.subr.bf16.mxu1 %v1889_v1  ;;  %v1050_v52 = vpack.c.bf16 %v1049_v51, %v1048_v50 }
 0x5d5   : > { %1487 = vmatmul.mubr.msk.bf16.vlgmr.msra.gmra.mrb[20].mxu1 %vm639_vm3, %v919_v47 }
 0x5d6   : > { %1497 = vmatpush3.bf16.msra.mxu1 %v1052_v49  ;;  %1498 = vmatprep.mubr.msk.bf16.mxu1 %vm1890_vm1, %v1889_v1 }
 0x5dd   : > { %1499 = vmatmul.mubr.msk.bf16.vlgmr.msra.gmra.mrb[24].mxu1 %vm639_vm3, %v1050_v52 }
 0x6a0   : > { %v829_v58 = vpop.f32.mrb[16].mxu1 }
 0x6a1   : > { %v1476_v60 = vpop.f32.mrb[17].mxu1 }
 0x6a2   : > { %v832_v61 = vpop.f32.mrb[18].mxu1 }
 0x6a3   : > { %v836_v63 = vpack.c.bf16 %v832_v61, %v829_v58  ;;  %v1477_v0 = vpop.f32.mrb[19].mxu1 }
 0x6a5   : > { %838 = vrot.lane.b32.xlu1 %v836_v63, %s1894_s20 }
 0x6a8   : > { %v960_v2 = vpop.f32.mrb[20].mxu1 }
 0x6a9   : > { %v1488_v4 = vpop.f32.mrb[21].mxu1 }
 0x6aa   : > { %v963_v5 = vpop.f32.mrb[22].mxu1 }
 0x6ab   : > { %v967_v7 = vpack.c.bf16 %v963_v5, %v960_v2  ;;  %v1489_v8 = vpop.f32.mrb[23].mxu1 }
 0x6ad   : > { %969 = vrot.lane.b32.xlu0 %v967_v7, %s1895_s26  ;;  %s1806_s26 = sshll.u32 %s1897_s25, 4  ;;  %s1807_s26 = int_to_ptr.vmem [resolvable:$false] %s1806_s26 }
 0x6ae   : > { %p1809_p12 = scmp.lt.s32.totalorder %s2246_s10, %s1807_s26 }
 0x6b0   : > { %v1091_v9 = vpop.f32.mrb[24].mxu1 }
 0x6b1   : > { %v1500_v10 = vpop.f32.mrb[25].mxu1 }
 0x6b2   : > { %v1094_v11 = vpop.f32.mrb[26].mxu1 }
 0x6b3   : > { %v1098_v12 = vpack.c.bf16 %v1094_v11, %v1091_v9  ;;  %v1501_v13 = vpop.f32.mrb[27].mxu1 }
 0x6b5   : > { %1100 = vrot.lane.b32.xlu1 %v1098_v12, %s1896_s9  ;;  %s1808_s9 = scalar_lea.vmem %s1807_s26, 512 }
 0x6b6   : > { %p1810_p2 = scmp.lt.s32.totalorder %s1808_s9, %s1802_s7 }
 0x6b8   : > { %p1811_p1 = por %p1810_p2, %p1809_p12 }
 0x6ba   : > { %p1812_p4 = pnand %p1811_p1, %p1805_p7 }
 0x717   : > { %v839_v14 = vpop.permute.xlu1 %838 }
 0x718   : > { %842 = vst.msk [vmem:[#allocation2] sm:$0xff] %vm841_vm4, %v839_v14 }
 0x71f   : > { %v970_v15 = vpop.permute.xlu0 %969 }
 0x720   : > { %973 = vst.msk [vmem:[#allocation2] sm:$0xff] %vm972_vm5, %v970_v15 }
 0x727   : > { %v1101_v1 = vpop.permute.xlu1 %1100 }
 0x728   : > { %1104 = vst.msk [vmem:[#allocation2] sm:$0xff] %vm1103_vm6, %v1101_v1 }
 0x72f   : > { %v1105_v16 = vld [vmem:[#allocation2] sm:$0xff] }
 0x730   : > { %1519 = vmatmul.mubr.bf16.vlgmr.msra.gmra.mrb[12].mxu0 %v1105_v16 }
 0x803   : > { %v1211_v18 = vpop.f32.mrb[12].mxu0 }
 0x804   : > { %v1212_v19 = vadd.f32 %v1384_v17, %v1211_v18  ;;  %v1520_v20 = vpop.f32.mrb[13].mxu0 }
 0x805   : > { %v1214_v21 = vpop.f32.mrb[14].mxu0 }
 0x806   : > { %1218 = vst [vmem:[%s313_s17] sm:$0xff] %v1212_v19  ;;  %v1215_v22 = vadd.f32 %v1384_v17, %v1214_v21  ;;  %v1521_v23 = vpop.f32.mrb[15].mxu0 }
 0x808   : > { %1219 = vst [vmem:[%s313_s17 + $0x8] sm:$0xff] %v1215_v22 }
 0x809   : > { %1815 = shalt.err (!%p1812_p4)
}
 0x80a   : > { %s1816_s15 = scalar_lea.hbm %s2251_s19, 256  ;;  %s1820_s17 = scalar_lea.hbm %s2302_s6, 512 }
 0x80b   : > { %p1817_p9 = scmp.ne.s32.totalorder %s2251_s19, %s1816_s15  ;;  %p1821_p8 = scmp.lt.u32.totalorder %s2251_s19, %s2302_s6 }
 0x80c   : > { %p1822_p13 = scmp.lt.u32.totalorder %s1820_s17, %s1816_s15  ;;  %p1824_p10 = scmp.lt.u32.totalorder %s1816_s15, %s2251_s19 }
 0x80d   : > { %p1818_p0 = pnand %p1817_p9, %p2079_p5 }
 0x80e   : > { %p1823_p6 = por %p1822_p13, %p1821_p8 }
 0x80f   : > { %p1819_p11 = pneg %p1818_p0 }
 0x810   : > { %p1825_p3 = por %p1824_p10, %p1823_p6 }
 0x812   : > { %p1826_p7 = pnand %p1825_p3, %p1819_p11 }
 0x814   : > { %1829 = shalt.err (!%p1826_p7)
}
 0x815   : > { %s1898_s29 = smov 128  }
 0x816   : > { %1536 = dma.vmem_to_hbm [thread:$0]  (%p2079_p5), %s2246_s10, 256, %s2251_s19, %s1221_s16, %s1898_s29, %s1898_s29, %s1894_s20  }
 0x817 PF: > { %s1249_s7 = sand.u32 1, %s1864_s21   ;;  %p2320_p12 = scmp.ne.s32.totalorder %s2307_s28, 0 }
 0x818   : > { %p2321_p2 = scmp.ge.s32.totalorder %s1876_s24, 2  ;;  %s1250_s25 = scalar_lea.sflag [#allocation5], %s1249_s7 }
 0x81a   : > { %p1553_p1 = pnand %p2321_p2, %p2320_p12 }
 0x81c   : > { %1859 = dma.done.wait (!%p1553_p1), %s1250_s25, 256  }
 0x81d   : > { %1861 = vsyncadd (!%p1553_p1), %s1250_s25, 4294967040  ;;  %p21_p4 = scmp.ge.s32.totalorder %s2065_s30, 4   ;;  %s2322_s21 = smov %s1868_s22 }
 0x81e   : > { %s2323_s22 = smov %s1872_s23  ;;  %s2324_s23 = smov %s2075_s13 }
 0x81f   : > { %s2325_s24 = smov %s2065_s30  ;;  %23 = sbr.rel (!%p21_p4) target bundleno = 7 (0x7), region = 104 }
 0x826   :  { %1255 = vsyncpa [#allocation4], 1 }
 0x827   :  { %1257 = vsyncpa [#allocation4 + $0x1], 1 }
 0x828   :  { %1258 = vsyncpa [#allocation7], 1 }
 0x829   :  { %1259 = vsyncpa [#allocation10], 1 }
 0x82a   :  { %1260 = vsyncpa [#allocation5], 1 }
 0x82b   :  { %1262 = vsyncpa [#allocation5 + $0x1], 1 }

// kernel: tpu_custom_call.1
= control target key start
LH: loop header
LB: loop body
LE: loop exit
PB: predicated region body
PF: predicated region fallthrough
CT: control target
= control target key end

     0   :  { %11 = vsyncpa [#allocation4], 0  ;;  %s2296_s0 = inlined_call_operand.hbm [shape: bf16[2,16,128], index: 0, kind: input, shape index: {}]   ;;  %s2297_s1 = inlined_call_operand.hbm [shape: bf16[128,384], index: 1, kind: input, shape index: {}]   ;;  %s2298_s2 = inlined_call_operand.vmem [shape: f32[1,384], index: 2, kind: input, shape index: {}]   ;;  %s2299_s3 = inlined_call_operand.hbm [shape: f32[4,16,16], index: 3, kind: input, shape index: {}]   ;;  %s2300_s4 = inlined_call_operand.hbm [shape: bf16[128,128], index: 4, kind: input, shape index: {}]   ;;  %s2301_s5 = inlined_call_operand.vmem [shape: f32[1,128], index: 5, kind: input, shape index: {}]   ;;  %s2302_s6 = inlined_call_operand.hbm [shape: f32[2,16,128], index: 6, kind: output, shape index: {}]  }
   0x1   :  { %13 = vsyncpa [#allocation4 + $0x1], 0 }
   0x2   :  { %14 = vsyncpa [#allocation7], 0 }
   0x3   :  { %15 = vsyncpa [#allocation10], 0 }
   0x4   :  { %16 = vsyncpa [#allocation5], 0 }
   0x5   :  { %18 = vsyncpa [#allocation5 + $0x1], 0  ;;  %s1934_s21 = smov 0   ;;  %s1936_s22 = smov 0  }
   0x6   :  { %s1938_s23 = smov 0   ;;  %s1940_s24 = smov 0  }
   0x7 LB: > { %s1955_s25 = sadd.s32 4294967295, %s1876_s24   ;;  %s1336_s26 = sadd.s32 4294967294, %s1876_s24   ;;  %s1876_s24 = sphi %s1940_s24, %s2325_s24   ;;  %s1872_s23 = sphi %s1938_s23, %s2324_s23   ;;  %s1868_s22 = sphi %s1936_s22, %s2323_s22   ;;  %s1864_s21 = sphi %s1934_s21, %s2322_s21  }
   0x8   : > { %p44_p0 = scmp.ne.s32.totalorder %s1868_s22, %s1864_s21  ;;  %p2303_p1 = scmp.eq.s32.totalorder %s1955_s25, 0 }
   0x9   : > { %p179_p3 = scmp.eq.s32.totalorder %s1336_s26, 1  ;;  %p1337_p5 = scmp.ge.s32.totalorder %s1876_s24, 1 }
   0xa   : > { %p1964_p4 = por %p2303_p1, %p44_p0  ;;  %p186_p7 = scmp.lt.s32.totalorder %s1876_s24, 3 }
   0xb   : > { %p1969_p6 = por %p179_p3, %p44_p0  ;;  %s1878_s30 = smov [#allocation6]  }
   0xc   : > { %s2306_s27 = scalar_select %p1964_p4, 1, 0 }
   0xd   : > { %s2307_s28 = scalar_select %p1969_p6, 1, 0 }
   0xe   : > { %p1974_p8 = pnand %p1337_p5, %p186_p7  ;;  %s198_s7 = sshll.u32 %s1878_s30, 4  ;;  %s1978_s7 = int_to_ptr.vmem [resolvable:$true] %s198_s7 }
   0xf   : > { %s1879_s9 = smov [#allocation8]   ;;  %s1688_s13 = scalar_lea.hbm %s2297_s1, 3072 }
  0x10   : > { %s2308_s29 = scalar_select %p1974_p8, 1, 0 }
  0x11   : > { %p1538_p9 = pneg %p1974_p8  ;;  %s214_s10 = sshll.u32 %s1879_s9, 4  ;;  %s1989_s10 = int_to_ptr.vmem [resolvable:$true] %s214_s10 }
  0x12   : > { %p1689_p12 = scmp.ne.s32.totalorder %s2297_s1, %s1688_s13  ;;  %p1695_p5 = scmp.lt.u32.totalorder %s1688_s13, %s2297_s1 }
  0x13   : > { %p1985_p11 = pnand %p1538_p9, %p2303_p1 }
  0x15   : > { %p1999_p13 = pneg %p1985_p11 }
  0x17   : > { %p1691_p0 = pnand %p1999_p13, %p1689_p12 }
  0x19   : > { %p1692_p3 = pneg %p1691_p0 }
  0x1b   : > { %p1697_p7 = pnand %p1695_p5, %p1692_p3 }
  0x1d   : > { %1700 = shalt.err (!%p1697_p7)
}
  0x1e   : > { %s1701_s19 = scalar_lea.vmem %s1978_s7, 3072  ;;  %p1709_p2 = scmp.lt.s32.totalorder %s1978_s7, %s1978_s7 }
  0x1f   : > { %p1702_p9 = scmp.ne.s32.totalorder %s1978_s7, %s1701_s19  ;;  %p1710_p6 = scmp.lt.s32.totalorder %s1701_s19, %s1701_s19 }
  0x21   : > { %p1704_p10 = pnand %p1702_p9, %p1999_p13  ;;  %p1711_p12 = por %p1710_p6, %p1709_p2 }
  0x23   : > { %p1705_p1 = pneg %p1704_p10 }
  0x25   : > { %p1712_p0 = pnand %p1711_p12, %p1705_p1 }
  0x27   : > { %1715 = shalt.err (!%p1712_p0)
}
  0x28   : > { %s1880_s20 = smov 192   ;;  %s1881_s26 = smov 12  }
  0x29   : > { %1541 = dma.hbm_to_vmem [thread:$0]  (!%p1985_p11), %s2297_s1, 3072, %s1978_s7, [#allocation7], %s1880_s20, %s1880_s20, %s1881_s26  }
  0x2a   : > { %s1716_s13 = scalar_lea.hbm %s2299_s3, 1024 }
  0x2b   : > { %p1717_p2 = scmp.ne.s32.totalorder %s2299_s3, %s1716_s13  ;;  %p1723_p10 = scmp.lt.u32.totalorder %s1716_s13, %s2299_s3 }
  0x2d   : > { %p1719_p1 = pnand %p1717_p2, %p1999_p13 }
  0x2f   : > { %p1720_p6 = pneg %p1719_p1 }
  0x31   : > { %p1725_p3 = pnand %p1723_p10, %p1720_p6 }
  0x33   : > { %1728 = shalt.err (!%p1725_p3)
}
  0x34   : > { %s1729_s7 = scalar_lea.vmem %s1989_s10, 1024  ;;  %p1737_p12 = scmp.lt.s32.totalorder %s1989_s10, %s1989_s10 }
  0x35   : > { %p1730_p5 = scmp.ne.s32.totalorder %s1989_s10, %s1729_s7  ;;  %p1738_p0 = scmp.lt.s32.totalorder %s1729_s7, %s1729_s7 }
  0x37   : > { %p1732_p7 = pnand %p1730_p5, %p1999_p13  ;;  %p1739_p2 = por %p1738_p0, %p1737_p12 }
  0x39   : > { %p1733_p9 = pneg %p1732_p7 }
  0x3b   : > { %p1740_p1 = pnand %p1739_p2, %p1733_p9 }
  0x3d   : > { %1743 = shalt.err (!%p1740_p1)
}
  0x3e   : > { %s1882_s19 = smov 128   ;;  %s1883_s20 = smov 8  }
  0x3f   : > { %1544 = dma.hbm_to_vmem [thread:$0]  (!%p1985_p11), %s2299_s3, 1024, %s1989_s10, [#allocation7], %s1882_s19, %s1882_s19, %s1883_s20  }
  0x40   : > { %s1884_s9 = smov [#allocation9]   ;;  %s1744_s14 = scalar_lea.hbm %s2300_s4, 1024 }
  0x41   : > { %s227_s11 = sshll.u32 %s1884_s9, 4  ;;  %p1745_p6 = scmp.ne.s32.totalorder %s2300_s4, %s1744_s14  ;;  %s228_s11 = int_to_ptr.vmem [resolvable:$true] %s227_s11 }
  0x42   : > { %p1751_p5 = scmp.lt.u32.totalorder %s1744_s14, %s2300_s4 }
  0x43   : > { %p1747_p10 = pnand %p1745_p6, %p1999_p13 }
  0x45   : > { %p1748_p3 = pneg %p1747_p10 }
  0x47   : > { %p1753_p7 = pnand %p1751_p5, %p1748_p3 }
  0x49   : > { %1756 = shalt.err (!%p1753_p7)
}
  0x4a   : > { %s1757_s10 = scalar_lea.vmem %s228_s11, 1024  ;;  %p1765_p2 = scmp.lt.s32.totalorder %s228_s11, %s228_s11 }
  0x4b   : > { %p1758_p9 = scmp.ne.s32.totalorder %s228_s11, %s1757_s10  ;;  %p1766_p1 = scmp.lt.s32.totalorder %s1757_s10, %s1757_s10 }
  0x4d   : > { %p1760_p12 = pnand %p1758_p9, %p1999_p13  ;;  %p1767_p4 = por %p1766_p1, %p1765_p2 }
  0x4f   : > { %p1761_p0 = pneg %p1760_p12 }
  0x51   : > { %p1768_p8 = pnand %p1767_p4, %p1761_p0 }
  0x53   : > { %1771 = shalt.err (!%p1768_p8)
}
  0x54   : > { %s1885_s19 = smov 64   ;;  %s1886_s16 = smov 4  }
  0x55   : > { %1547 = dma.hbm_to_vmem [thread:$0]  (!%p1985_p11), %s2300_s4, 1024, %s228_s11, [#allocation10], %s1885_s19, %s1885_s19, %s1886_s16  }
  0x56   : > { %s2065_s30 = sadd.s32 1, %s1876_s24   ;;  %s31_s12 = sadd.s32 1, %s1872_s23 }
  0x57   : > { %s28_s9 = ssub.s32 %s1876_s24, %s2065_s30  ;;  %p38_p8 = scmp.ne.s32.totalorder %s1872_s23, %s1868_s22 }
  0x58   : > { %p29_p4 = scmp.eq.s32.totalorder %s28_s9, 0  ;;  %p39_p13 = scmp.eq.s32.totalorder %s1876_s24, 0 }
  0x59   : > { %p1559_p6 = scmp.lt.s32.totalorder %s1876_s24, 2  ;;  %p2311_p3 = scmp.eq.s32.totalorder %s1955_s25, 1 }
  0x5a   : > { %s2075_s13 = scalar_select %p29_p4, %s1872_s23, %s31_s12  }
  0x5b   : > { %p40_p10 = por %p39_p13, %p38_p8  ;;  %p2079_p5 = por %p2311_p3, %p38_p8 }
  0x5c   : > { %s244_s14 = sand.u32 1, %s1872_s23   ;;  %s1398_s15 = sshll.u32 %s1876_s24, 7 }
  0x5d   : > { %s1342_s11 = sshll.u32 %s244_s14, 3  ;;  %s2088_s7 = scalar_lea.hbm %s2296_s0, %s1398_s15 }
  0x5e   : > { %s248_s10 = scalar_lea.vmem [#allocation3], %s1342_s11  ;;  %p2090_p11 = pnand %p1559_p6, %p40_p10 }
  0x5f   : > { %s255_s20 = sshll.u32 %s248_s10, 4  ;;  %s2096_s9 = scalar_lea.sflag [#allocation4], %s244_s14  ;;  %s2094_s20 = int_to_ptr.vmem [resolvable:$true] %s255_s20 }
  0x60   : > { %s1772_s12 = scalar_lea.hbm %s2088_s7, 128  ;;  %p1774_p9 = pneg %p2090_p11 }
  0x61   : > { %p1773_p7 = scmp.ne.s32.totalorder %s2088_s7, %s1772_s12  ;;  %s1777_s17 = scalar_lea.hbm %s2296_s0, 256 }
  0x62   : > { %p1778_p2 = scmp.lt.u32.totalorder %s2088_s7, %s2296_s0  ;;  %p1779_p1 = scmp.lt.u32.totalorder %s1777_s17, %s1772_s12 }
  0x63   : > { %p1775_p12 = pnand %p1774_p9, %p1773_p7  ;;  %p1781_p8 = scmp.lt.u32.totalorder %s1772_s12, %s2088_s7 }
  0x64   : > { %p1780_p4 = por %p1779_p1, %p1778_p2 }
  0x65   : > { %p1776_p0 = pneg %p1775_p12 }
  0x66   : > { %p1782_p13 = por %p1781_p8, %p1780_p4 }
  0x68   : > { %p1783_p6 = pnand %p1782_p13, %p1776_p0 }
  0x6a   : > { %1786 = shalt.err (!%p1783_p6)
}
  0x6b   : > { %s1787_s14 = scalar_lea.vmem %s2094_s20, 128  ;;  %s1887_s15 = smov [#allocation3]  }
  0x6c   : > { %p1788_p10 = scmp.ne.s32.totalorder %s2094_s20, %s1787_s14  ;;  %s1792_s11 = sshll.u32 %s1887_s15, 4  ;;  %s1793_s11 = int_to_ptr.vmem [resolvable:$false] %s1792_s11 }
  0x6d   : > { %s1794_s18 = scalar_lea.vmem %s1793_s11, 256  ;;  %p1795_p12 = scmp.lt.s32.totalorder %s2094_s20, %s1793_s11 }
  0x6e   : > { %p1790_p3 = pnand %p1788_p10, %p1774_p9  ;;  %p1796_p2 = scmp.lt.s32.totalorder %s1794_s18, %s1787_s14 }
  0x70   : > { %p1791_p7 = pneg %p1790_p3  ;;  %p1797_p1 = por %p1796_p2, %p1795_p12 }
  0x72   : > { %p1798_p4 = pnand %p1797_p1, %p1791_p7 }
  0x74   : > { %1801 = shalt.err (!%p1798_p4)
}
  0x75   : > { %1551 = dma.hbm_to_vmem [thread:$0]  (!%p2090_p11), %s2088_s7, 128, %s2094_s20, %s2096_s9, %s1885_s19, %s1885_s19, %s1886_s16  }
  0x76   : > { %p2314_p9 = scmp.ne.s32.totalorder %s2308_s29, 0 }
  0x77   : > { %s2130_s12 = sand.u32 (!%p2314_p9), 1, %s1868_s22   ;;  %p2315_p0 = scmp.ne.s32.totalorder (!%p2314_p9), %s2306_s27, 0 }
  0x78   : > { %267 = sbr.rel (%p2314_p9) target bundleno = 2071 (0x817), region = 44  ;;  %s1346_s17 = sshll.u32 (!%p2314_p9), %s2130_s12, 3 }
  0x79   : > { %s270_s10 = scalar_lea.sflag (!%p2314_p9), [#allocation4], %s2130_s12  ;;  %s2134_s14 = scalar_lea.vmem (!%p2314_p9), [#allocation3], %s1346_s17 }
  0x7f   : > { %1847 = dma.done.wait (%p2315_p0), %s270_s10, 128  }
  0x80   : > { %1849 = vsyncadd (%p2315_p0), %s270_s10, 4294967168  ;;  %p2316_p11 = scmp.eq.s32.totalorder %s1955_s25, 0 }
  0x82   : > { %1851 = dma.done.wait (%p2316_p11), [#allocation7], 4096   ;;  %p2317_p8 = pmov %p2316_p11 }
  0x84   : > { %1853 = vsyncadd (%p2317_p8), [#allocation7], 4294963200  ;;  %p2318_p13 = pmov %p2317_p8 }
  0x85   : > { %p2319_p6 = pmov %p2317_p8 }
  0x86   : > { %1855 = dma.done.wait (%p2318_p13), [#allocation10], 1024  }
  0x87   : > { %1857 = vsyncadd (%p2319_p6), [#allocation10], 4294966272  ;;  %vm315_vm0 = vcmask 1047808   ;;  %v1888_v0 = vmov 0   ;;  %v1889_v1 = vmov 0.0   ;;  %v1639_v23 = vld [vmem:[%s2134_s14] sm:$0xff]   ;;  %v353_v27 = vlaneseq }
  0x88   : > { %316 = vst.msk [vmem:[#allocation2] sm:$0xff] %vm315_vm0, %v1888_v0  ;;  %534 = vmatprep.mubr.bf16.mxu0 %v1888_v0  ;;  %1434 = vmatprep.subr.bf16.mxu1 %v1889_v1  ;;  %v1615_v2 = vld [vmem:[#allocation6 + $0x4] ss:$12 sps:$4 sm:$0xff]   ;;  %v1617_v3 = vld [vmem:[#allocation6] ss:$12 sps:$4 sm:$0xff]   ;;  %vm1890_vm1 = vmmov 0  }
  0x89   : > { %502 = vmatprep.subr.bf16.mxu0 %v1615_v2  ;;  %v1618_v4 = vld [vmem:[#allocation6 + $0x1c] ss:$12 sps:$4 sm:$0xff]   ;;  %v1620_v5 = vld [vmem:[#allocation6 + $0x18] ss:$12 sps:$4 sm:$0xff]   ;;  %v1621_v6 = vld [vmem:[#allocation6 + $0x34] ss:$12 sps:$4 sm:$0xff]   ;;  %1450 = vmatprep.mubr.msk.bf16.mxu1 %vm1890_vm1, %v1889_v1 }
  0x8a   : > { %503 = vmatpush1.bf16.msra.mxu0 %v1617_v3  ;;  %v1623_v7 = vld [vmem:[#allocation6 + $0x30] ss:$12 sps:$4 sm:$0xff]   ;;  %v1624_v8 = vld [vmem:[#allocation6 + $0x4c] ss:$12 sps:$4 sm:$0xff]   ;;  %v1626_v9 = vld [vmem:[#allocation6 + $0x48] ss:$12 sps:$4 sm:$0xff]  }
  0x8b   : > { %504 = vmatprep.subr.bf16.mxu0 %v1618_v4  ;;  %v1627_v10 = vld [vmem:[#allocation6 + $0x64] ss:$12 sps:$4 sm:$0xff]   ;;  %v1640_v11 = vld [vmem:[#allocation6 + $0x8] ss:$12 sps:$4 sm:$0xff]   ;;  %v1641_v12 = vld [vmem:[#allocation6 + $0x20] ss:$12 sps:$4 sm:$0xff]  }
  0x8c   : > { %1435 = vmatpush3.bf16.msra.mxu1 %v1640_v11  ;;  %v1629_v13 = vld [vmem:[#allocation6 + $0x60] ss:$12 sps:$4 sm:$0xff]   ;;  %v1630_v14 = vld [vmem:[#allocation6 + $0x7c] ss:$12 sps:$4 sm:$0xff]   ;;  %v1632_v15 = vld [vmem:[#allocation6 + $0x78] ss:$12 sps:$4 sm:$0xff]  }
  0x8d   : > { %1436 = vmatprep.subr.bf16.mxu1 %v1889_v1  ;;  %v1633_v16 = vld [vmem:[#allocation6 + $0x94] ss:$12 sps:$4 sm:$0xff]   ;;  %v1642_v17 = vld [vmem:[#allocation6 + $0x38] ss:$12 sps:$4 sm:$0xff]   ;;  %v1643_v18 = vld [vmem:[#allocation6 + $0x50] ss:$12 sps:$4 sm:$0xff]  }
  0x8e   : > { %505 = vmatpush1.bf16.msra.mxu0 %v1620_v5  ;;  %v1635_v19 = vld [vmem:[#allocation6 + $0x90] ss:$12 sps:$4 sm:$0xff]   ;;  %v1636_v20 = vld [vmem:[#allocation6 + $0xac] ss:$12 sps:$4 sm:$0xff]   ;;  %v1644_v21 = vld [vmem:[#allocation6 + $0x68] ss:$12 sps:$4 sm:$0xff]  }
  0x8f   : > { %506 = vmatprep.subr.bf16.mxu0 %v1621_v6  ;;  %v1638_v22 = vld [vmem:[#allocation6 + $0xa8] ss:$12 sps:$4 sm:$0xff]   ;;  %v1645_v24 = vld [vmem:[#allocation6 + $0x80] ss:$12 sps:$4 sm:$0xff]   ;;  %v1646_v25 = vld [vmem:[#allocation6 + $0x98] ss:$12 sps:$4 sm:$0xff]  }
  0x90   : > { %1437 = vmatpush3.bf16.msra.mxu1 %v1641_v12  ;;  %v1647_v26 = vld [vmem:[#allocation6 + $0xb0] ss:$12 sps:$4 sm:$0xff]   ;;  %v354_v28 = vshrl.u32 %v353_v27, 7  ;;  %v351_v30 = vld [vmem:[%s2298_s2] sm:$0x7]  ;;  %vm591_vm2 = vcmask 64512  }
  0x91   : > { %1438 = vmatprep.subr.bf16.mxu1 %v1889_v1  ;;  %v589_v54 = vld [vmem:[#allocation8] sm:$0xff]  ;;  %v590_v56 = vld [vmem:[#allocation8 + $0x8] sm:$0xff]  ;;  %vm639_vm3 = vcmask 130048   ;;  %s1891_s19 = smov 120   ;;  %s1892_s16 = smov 104   ;;  %vm841_vm4 = vcmask 130112  }
  0x92   : > { %507 = vmatpush1.bf16.msra.mxu0 %v1623_v7  ;;  %v355_v29 = vsub.s32 0, %v354_v28  ;;  %v359_v31 = vsub.s32 1, %v354_v28  ;;  %v363_v45 = vsub.s32 2, %v354_v28  ;;  %s1893_s7 = smov 112   ;;  %s1894_s20 = smov 8   ;;  %vm972_vm5 = vcmask 195712  }
  0x93   : > { %508 = vmatprep.subr.bf16.mxu0 %v1624_v8  ;;  %s1895_s26 = smov 16   ;;  %s1896_s9 = smov 24   ;;  %vm1103_vm6 = vcmask 261312  }
  0x94   : > { %1439 = vmatpush3.bf16.msra.mxu1 %v1642_v17  ;;  %v356_v32 = vrot.slane %v351_v30, %v355_v29  ;;  %v360_v34 = vrot.slane %v351_v30, %v359_v31  ;;  %v364_v46 = vrot.slane %v351_v30, %v363_v45  ;;  %v976_v45 = vld [vmem:[#allocation8 + $0x38] sm:$0xff]  ;;  %s1350_s15 = sshll.u32 %s2130_s12, 4  ;;  %s1399_s14 = sshll.u32 %s1955_s25, 8 }
  0x95   : > { %1440 = vmatprep.subr.bf16.mxu1 %v1889_v1  ;;  %s313_s17 = scalar_lea.vmem [#allocation11], %s1350_s15  ;;  %s1897_s25 = smov [#allocation11]  }
  0x96   : > { %509 = vmatpush1.bf16.msra.mxu0 %v1626_v9  ;;  %s1234_s10 = sshll.u32 %s313_s17, 4  ;;  %s2246_s10 = int_to_ptr.vmem [resolvable:$true] %s1234_s10 }
  0x97   : > { %510 = vmatprep.subr.bf16.mxu0 %v1627_v10 }
  0x98   : > { %1441 = vmatpush3.bf16.msra.mxu1 %v1643_v18 }
  0x99   : > { %1442 = vmatprep.subr.bf16.mxu1 %v1889_v1 }
  0x9a   : > { %511 = vmatpush1.bf16.msra.mxu0 %v1629_v13 }
  0x9b   : > { %512 = vmatprep.subr.bf16.mxu0 %v1630_v14 }
  0x9c   : > { %1443 = vmatpush3.bf16.msra.mxu1 %v1644_v21 }
  0x9d   : > { %1444 = vmatprep.subr.bf16.mxu1 %v1889_v1 }
  0x9e   : > { %513 = vmatpush1.bf16.msra.mxu0 %v1632_v15 }
  0x9f   : > { %514 = vmatprep.subr.bf16.mxu0 %v1633_v16 }
  0xa0   : > { %1445 = vmatpush3.bf16.msra.mxu1 %v1645_v24 }
  0xa1   : > { %1446 = vmatprep.subr.bf16.mxu1 %v1889_v1 }
  0xa2   : > { %515 = vmatpush1.bf16.msra.mxu0 %v1635_v19 }
  0xa3   : > { %516 = vmatprep.subr.bf16.mxu0 %v1636_v20 }
  0xa4   : > { %1447 = vmatpush3.bf16.msra.mxu1 %v1646_v25 }
  0xa5   : > { %1448 = vmatprep.subr.bf16.mxu1 %v1889_v1 }
  0xa6   : > { %517 = vmatpush1.bf16.msra.mxu0 %v1638_v22 }
  0xa7   : > { %1478 = vmatprep.subr.bf16.mxu0 %v1889_v1 }
  0xa8   : > { %1449 = vmatpush3.bf16.msra.mxu1 %v1647_v26 }
  0xa9   : > { %535 = vmatmul.mubr.bf16.vlgmr.msra.gmra.mrb[0].mxu0 %v1639_v23  ;;  %1454 = vmatprep.subr.bf16.mxu1 %v1889_v1 }
  0xaa   : > { %1480 = vmatprep.mubr.msk.bf16.mxu0 %vm1890_vm1, %v1889_v1 }
  0xab   : > { %1451 = vmatmul.mubr.bf16.vlgmr.msra.gmra.mrb[0].mxu1 %v1639_v23 }
  0xac   : > { %1456 = vmatprep.mubr.msk.bf16.mxu1 %vm1890_vm1, %v1889_v1 }
 0x17c   : > { %v536_v33 = vpop.f32.mrb[0].mxu0 }
 0x17d   : > { %v538_v35 = vpop.f32.mrb[1].mxu0  ;;  %v537_v37 = vadd.f32 %v536_v33, %v356_v32 }
 0x17e   : > { %v540_v36 = vpop.f32.mrb[2].mxu0  ;;  %v539_v40 = vadd.f32 %v538_v35, %v360_v34  ;;  %v579_v47 = vpop.f32.mrb[0].mxu1 }
 0x17f   : > { %v541_v38 = vadd.f32 %v540_v36, %v356_v32  ;;  %v542_v39 = vpop.f32.mrb[3].mxu0  ;;  %v580_v48 = vadd.f32 %v579_v47, %v364_v46  ;;  %v1452_v49 = vpop.f32.mrb[1].mxu1  ;;  %v710_v36 = vld [vmem:[#allocation8 + $0x10] sm:$0xff] }
 0x180   : > { %v543_v41 = vadd.f32 %v542_v39, %v360_v34  ;;  %v582_v50 = vpop.f32.mrb[2].mxu1  ;;  %v711_v39 = vld [vmem:[#allocation8 + $0x18] sm:$0xff] }
 0x181   : > { %v586_v42 = vpack.c.bf16 %v541_v38, %v537_v37  ;;  %v583_v51 = vadd.f32 %v582_v50, %v364_v46  ;;  %v1453_v52 = vpop.f32.mrb[3].mxu1  ;;  %v844_v37 = vld [vmem:[#allocation8 + $0x20] sm:$0xff] }
 0x182   : > { %v587_v43 = vpack.c.bf16 %v543_v41, %v539_v40 }
 0x183   : > { %v2173_v53 = vpack.c.bf16 %v583_v51, %v580_v48  ;;  %v845_v51 = vld [vmem:[#allocation8 + $0x28] sm:$0xff] }
 0x184   : > { %v596_v44 = vsel %vm591_vm2, %v587_v43, 0 }
 0x185   : > { %1455 = vmatpush3.bf16.xpose.msra.mxu1 %v596_v44 }
 0x186   : > { %1460 = vmatprep.subr.bf16.mxu1 %v1889_v1 }
 0x18c   : > { %1457 = vmatmul.mubr.msk.bf16.vlgmr.msra.gmra.mrb[4].mxu1 %vm591_vm2, %v586_v42 }
 0x18d   : > { %1462 = vmatprep.mubr.msk.bf16.mxu1 %vm1890_vm1, %v1889_v1  ;;  %1461 = vmatpush3.bf16.msra.mxu1 %v2173_v53 }
 0x18e   : > { %1466 = vmatprep.subr.bf16.mxu1 %v1889_v1 }
 0x25f   : > { %v632_v55 = vpop.f32.mrb[4].mxu1 }
 0x260   : > { %v633_v57 = vadd.f32 %v632_v55, %v589_v54  ;;  %v1458_v58 = vpop.f32.mrb[5].mxu1 }
 0x261   : > { %v635_v59 = vpop.f32.mrb[6].mxu1  ;;  %v975_v58 = vld [vmem:[#allocation8 + $0x30] sm:$0xff] }
 0x262   : > { %v636_v60 = vadd.f32 %v635_v59, %v590_v56  ;;  %v1459_v61 = vpop.f32.mrb[7].mxu1  ;;  %v640_v62 = vsel %vm639_vm3, %v633_v57, -inf }
 0x263   : > { %641 = vmax.xlane.f32.xlu0 %v640_v62 }
 0x264   : > { %v643_v63 = vsel %vm639_vm3, %v636_v60, -inf }
 0x267   : > { %644 = vmax.xlane.f32.xlu0 %v643_v63 }
 0x27d   : > { %716 = vrot.lane.b32.xlu0 %v587_v43, %s1891_s19 }
 0x281   : > { %979 = vrot.lane.b32.xlu0 %v587_v43, %s1892_s16 }
 0x2f0   : > { %v642_v0 = vpop.xlane.xlu0 %641 }
 0x2f1   : > { %v646_v2 = vsub.f32 %v633_v57, %v642_v0 }
 0x2f3   : > { %v648_v3 = vmul.f32 1.442695, %v646_v2 }
 0x2f4   : > { %v645_v4 = vpop.xlane.xlu0 %644 }
 0x2f5   : > { %1656 = vpow2.f32 %v648_v3  ;;  %v647_v5 = vsub.f32 %v636_v60, %v645_v4 }
 0x2f7   : > { %v650_v6 = vmul.f32 1.442695, %v647_v5 }
 0x2f8   : > { %v717_v14 = vpop.permute.xlu0 %716 }
 0x2f9   : > { %1658 = vpow2.f32 %v650_v6  ;;  %v722_v23 = vsel %vm591_vm2, %v717_v14, 0 }
 0x2fc   : > { %v980_v21 = vpop.permute.xlu0 %979 }
 0x2fd   : > { %v985_v25 = vsel %vm591_vm2, %v980_v21, 0 }
 0x2ff   : > { %v1657_v7 = vpop.eup %1656 }
 0x300   : > { %v652_v8 = vsel %vm639_vm3, %v1657_v7, 0.0 }
 0x301   : > { %653 = vadd.xlane.f32.xlu1 %v652_v8 }
 0x303   : > { %v1659_v9 = vpop.eup %1658 }
 0x304   : > { %v655_v10 = vsel %vm639_vm3, %v1659_v9, 0.0 }
 0x305   : > { %656 = vadd.xlane.f32.xlu1 %v655_v10 }
 0x316   : > { %713 = vrot.lane.b32.xlu1 %v586_v42, %s1891_s19 }
 0x31a   : > { %848 = vrot.lane.b32.xlu1 %v587_v43, %s1893_s7 }
 0x31e   : > { %846 = vrot.lane.b32.xlu1 %v586_v42, %s1893_s7 }
 0x322   : > { %977 = vrot.lane.b32.xlu1 %v586_v42, %s1892_s16 }
 0x38e   : > { %v654_v11 = vpop.xlane.xlu1 %653 }
 0x38f   : > { %1660 = vrcp.f32 %v654_v11 }
 0x392   : > { %v657_v12 = vpop.xlane.xlu1 %656 }
 0x393   : > { %1662 = vrcp.f32 %v657_v12 }
 0x396   : > { %v714_v13 = vpop.permute.xlu1 %713 }
 0x399   : > { %v1661_v16 = vpop.eup %1660 }
 0x39a   : > { %v849_v15 = vpop.permute.xlu1 %848  ;;  %v660_v19 = vmul.f32 %v1661_v16, %v1657_v7 }
 0x39b   : > { %v854_v17 = vsel %vm591_vm2, %v849_v15, 0 }
 0x39c   : > { %1479 = vmatpush3.bf16.xpose.msra.mxu0 %v854_v17 }
 0x39d   : > { %v1663_v18 = vpop.eup %1662  ;;  %1490 = vmatprep.subr.bf16.mxu0 %v1889_v1 }
 0x39e   : > { %v661_v20 = vmul.f32 %v1663_v18, %v1659_v9  ;;  %v847_v24 = vpop.permute.xlu1 %846 }
 0x3a0   : > { %v662_v22 = vpack.c.bf16 %v661_v20, %v660_v19 }
 0x3a2   : > { %1463 = vmatmul.mubr.msk.bf16.vlgmr.msra.gmra.mrb[8].mxu1 %vm639_vm3, %v662_v22  ;;  %v978_v26 = vpop.permute.xlu1 %977 }
 0x3a3   : > { %1467 = vmatpush3.bf16.xpose.msra.mxu1 %v722_v23  ;;  %1481 = vmatmul.mubr.msk.bf16.vlgmr.msra.gmra.mrb[4].mxu0 %vm591_vm2, %v847_v24 }
 0x3a4   : > { %1491 = vmatpush3.bf16.xpose.msra.mxu0 %v985_v25  ;;  %1468 = vmatprep.mubr.msk.bf16.mxu1 %vm1890_vm1, %v1889_v1 }
 0x3a5   : > { %1492 = vmatprep.mubr.msk.bf16.mxu0 %vm1890_vm1, %v1889_v1  ;;  %1472 = vmatprep.subr.bf16.mxu1 %v1889_v1 }
 0x3a6   : > { %1502 = vmatprep.subr.bf16.mxu0 %v1889_v1 }
 0x3aa   : > { %1469 = vmatmul.mubr.msk.bf16.vlgmr.msra.gmra.mrb[12].mxu1 %vm591_vm2, %v714_v13 }
 0x3ab   : > { %1493 = vmatmul.mubr.msk.bf16.vlgmr.msra.gmra.mrb[8].mxu0 %vm591_vm2, %v978_v26  ;;  %1474 = vmatprep.mubr.msk.bf16.mxu1 %vm1890_vm1, %v1889_v1 }
 0x3ac   : > { %1518 = vmatprep.mubr.msk.bf16.mxu0 %vm1890_vm1, %v1889_v1 }
 0x475   : > { %v700_v27 = vpop.f32.mrb[8].mxu1 }
 0x476   : > { %v1464_v28 = vpop.f32.mrb[9].mxu1  ;;  %v890_v29 = vpop.f32.mrb[4].mxu0 }
 0x477   : > { %v703_v30 = vpop.f32.mrb[10].mxu1  ;;  %v1482_v31 = vpop.f32.mrb[5].mxu0  ;;  %v891_v46 = vadd.f32 %v890_v29, %v844_v37 }
 0x478   : > { %v707_v32 = vpack.c.bf16 %v703_v30, %v700_v27  ;;  %v1465_v33 = vpop.f32.mrb[11].mxu1  ;;  %v893_v34 = vpop.f32.mrb[6].mxu0 }
 0x479   : > { %v1483_v35 = vpop.f32.mrb[7].mxu0  ;;  %v894_v56 = vadd.f32 %v893_v34, %v845_v51  ;;  %v897_v57 = vsel %vm639_vm3, %v891_v46, -inf }
 0x47a   : > { %708 = vst.msk [vmem:[#allocation2] sm:$0xff] %vm591_vm2, %v707_v32 }
 0x47b   : > { %v900_v61 = vsel %vm639_vm3, %v894_v56, -inf }
 0x47d   : > { %v758_v38 = vpop.f32.mrb[12].mxu1 }
 0x47e   : > { %v759_v40 = vadd.f32 %v758_v38, %v710_v36  ;;  %v1470_v41 = vpop.f32.mrb[13].mxu1  ;;  %v1021_v42 = vpop.f32.mrb[8].mxu0 }
 0x47f   : > { %v761_v43 = vpop.f32.mrb[14].mxu1  ;;  %v1494_v44 = vpop.f32.mrb[9].mxu0  ;;  %v1022_v60 = vadd.f32 %v1021_v42, %v975_v58 }
 0x480   : > { %v762_v47 = vadd.f32 %v761_v43, %v711_v39  ;;  %v1471_v48 = vpop.f32.mrb[15].mxu1  ;;  %v1024_v49 = vpop.f32.mrb[10].mxu0  ;;  %v765_v50 = vsel %vm639_vm3, %v759_v40, -inf }
 0x481   : > { %v1495_v52 = vpop.f32.mrb[11].mxu0  ;;  %766 = vmax.xlane.f32.xlu0 %v765_v50  ;;  %v1025_v54 = vadd.f32 %v1024_v49, %v976_v45  ;;  %v1028_v62 = vsel %vm639_vm3, %v1022_v60, -inf }
 0x482   : > { %v768_v55 = vsel %vm639_vm3, %v762_v47, -inf }
 0x483   : > { %769 = vmax.xlane.f32.xlu1 %v768_v55  ;;  %v1031_v59 = vsel %vm639_vm3, %v1025_v54, -inf  ;;  %v1649_v55 = vld [vmem:[#allocation9 + $0x8] sm:$0xff]  }
 0x485   : > { %898 = vmax.xlane.f32.xlu0 %v897_v57  ;;  %v1651_v57 = vld [vmem:[#allocation9 + $0x18] sm:$0xff]  }
 0x487   : > { %1032 = vmax.xlane.f32.xlu1 %v1031_v59  ;;  %v1652_v59 = vld [vmem:[#allocation9 + $0x20] sm:$0xff]  }
 0x489   : > { %901 = vmax.xlane.f32.xlu0 %v900_v61 }
 0x48d   : > { %1029 = vmax.xlane.f32.xlu0 %v1028_v62  ;;  %v1653_v62 = vld [vmem:[#allocation9 + $0x28] sm:$0xff]  }
 0x50e   : > { %v767_v63 = vpop.xlane.xlu0 %766 }
 0x50f   : > { %v771_v9 = vsub.f32 %v759_v40, %v767_v63 }
 0x510   : > { %v770_v0 = vpop.xlane.xlu1 %769 }
 0x511   : > { %v772_v10 = vsub.f32 %v762_v47, %v770_v0  ;;  %v773_v15 = vmul.f32 1.442695, %v771_v9 }
 0x512   : > { %v899_v2 = vpop.xlane.xlu0 %898 }
 0x513   : > { %v903_v3 = vsub.f32 %v891_v46, %v899_v2  ;;  %v775_v16 = vmul.f32 1.442695, %v772_v10 }
 0x514   : > { %v1033_v4 = vpop.xlane.xlu1 %1032 }
 0x515   : > { %v905_v5 = vmul.f32 1.442695, %v903_v3  ;;  %v1035_v6 = vsub.f32 %v1025_v54, %v1033_v4  ;;  %v1648_v54 = vld [vmem:[#allocation9] sm:$0xff]   ;;  %v1654_v3 = vld [vmem:[#allocation9 + $0x30] sm:$0xff]  }
 0x516   : > { %v902_v7 = vpop.xlane.xlu0 %901  ;;  %1503 = vmatpush3.bf16.msra.mxu0 %v1648_v54 }
 0x517   : > { %1664 = vpow2.f32 %v905_v5  ;;  %v904_v8 = vsub.f32 %v894_v56, %v902_v7  ;;  %v1038_v11 = vmul.f32 1.442695, %v1035_v6  ;;  %1504 = vmatprep.subr.bf16.mxu0 %v1889_v1  ;;  %v1650_v56 = vld [vmem:[#allocation9 + $0x10] sm:$0xff]   ;;  %v1655_v6 = vld [vmem:[#allocation9 + $0x38] sm:$0xff]  }
 0x519   : > { %v907_v12 = vmul.f32 1.442695, %v904_v8 }
 0x51a   : > { %v1030_v13 = vpop.xlane.xlu0 %1029  ;;  %1505 = vmatpush3.bf16.msra.mxu0 %v1649_v55 }
 0x51b   : > { %1666 = vpow2.f32 %v907_v12  ;;  %v1034_v14 = vsub.f32 %v1022_v60, %v1030_v13  ;;  %1506 = vmatprep.subr.bf16.mxu0 %v1889_v1 }
 0x51c   : > { %1668 = vpow2.f32 %v1038_v11 }
 0x51d   : > { %v1036_v17 = vmul.f32 1.442695, %v1034_v14 }
 0x51e   : > { %1507 = vmatpush3.bf16.msra.mxu0 %v1650_v56 }
 0x51f   : > { %1670 = vpow2.f32 %v1036_v17  ;;  %1508 = vmatprep.subr.bf16.mxu0 %v1889_v1  ;;  %v1384_v17 = vld [vmem:[%s2301_s5] ss:$0 sm:$0xff] }
 0x520   : > { %1672 = vpow2.f32 %v773_v15 }
 0x521   : > { %v1665_v18 = vpop.eup %1664  ;;  %1674 = vpow2.f32 %v775_v16 }
 0x522   : > { %v909_v19 = vsel %vm639_vm3, %v1665_v18, 0.0  ;;  %1509 = vmatpush3.bf16.msra.mxu0 %v1651_v57 }
 0x523   : > { %910 = vadd.xlane.f32.xlu0 %v909_v19  ;;  %1510 = vmatprep.subr.bf16.mxu0 %v1889_v1 }
 0x525   : > { %v1667_v20 = vpop.eup %1666 }
 0x526   : > { %v912_v21 = vsel %vm639_vm3, %v1667_v20, 0.0  ;;  %v1669_v22 = vpop.eup %1668  ;;  %1511 = vmatpush3.bf16.msra.mxu0 %v1652_v59 }
 0x527   : > { %913 = vadd.xlane.f32.xlu1 %v912_v21  ;;  %v1043_v26 = vsel %vm639_vm3, %v1669_v22, 0.0  ;;  %1512 = vmatprep.subr.bf16.mxu0 %v1889_v1 }
 0x529   : > { %v1671_v23 = vpop.eup %1670 }
 0x52a   : > { %v1673_v24 = vpop.eup %1672  ;;  %v1040_v25 = vsel %vm639_vm3, %v1671_v23, 0.0  ;;  %1513 = vmatpush3.bf16.msra.mxu0 %v1653_v62 }
 0x52b   : > { %v1675_v27 = vpop.eup %1674  ;;  %1041 = vadd.xlane.f32.xlu0 %v1040_v25  ;;  %1044 = vadd.xlane.f32.xlu1 %v1043_v26  ;;  %v777_v28 = vsel %vm639_vm3, %v1673_v24, 0.0 }
 0x52c   : > { %v780_v29 = vsel %vm639_vm3, %v1675_v27, 0.0  ;;  %1514 = vmatprep.subr.bf16.mxu0 %v1889_v1 }
 0x52e   : > { %1515 = vmatpush3.bf16.msra.mxu0 %v1654_v3 }
 0x52f   : > { %778 = vadd.xlane.f32.xlu0 %v777_v28  ;;  %781 = vadd.xlane.f32.xlu1 %v780_v29 }
 0x530   : > { %1516 = vmatprep.subr.bf16.mxu0 %v1889_v1 }
 0x532   : > { %1517 = vmatpush3.bf16.msra.mxu0 %v1655_v6 }
 0x540   : > { %920 = vrot.lane.b32.xlu1 %v2173_v53, %s1893_s7  ;;  %s1802_s7 = scalar_lea.vmem %s2246_s10, 256 }
 0x541   : > { %p1803_p10 = scmp.ne.s32.totalorder %s2246_s10, %s1802_s7 }
 0x543   : > { %p1804_p3 = pnand %p1803_p10, %p2079_p5 }
 0x544   : > { %1051 = vrot.lane.b32.xlu1 %v2173_v53, %s1892_s16  ;;  %s1221_s16 = scalar_lea.sflag [#allocation5], %s2130_s12 }
 0x545   : > { %789 = vrot.lane.b32.xlu0 %v2173_v53, %s1891_s19  ;;  %s2251_s19 = scalar_lea.hbm %s2302_s6, %s1399_s14  ;;  %p1805_p7 = pneg %p1804_p3 }
 0x5b0   : > { %v911_v30 = vpop.xlane.xlu0 %910 }
 0x5b4   : > { %v914_v31 = vpop.xlane.xlu1 %913 }
 0x5b8   : > { %v1042_v32 = vpop.xlane.xlu0 %1041  ;;  %v1045_v33 = vpop.xlane.xlu1 %1044 }
 0x5bc   : > { %v779_v34 = vpop.xlane.xlu0 %778  ;;  %v782_v35 = vpop.xlane.xlu1 %781 }
 0x5bd   : > { %1676 = vrcp.f32 %v779_v34 }
 0x5be   : > { %1678 = vrcp.f32 %v782_v35 }
 0x5bf   : > { %1680 = vrcp.f32 %v914_v31 }
 0x5c0   : > { %v790_v36 = vpop.permute.xlu0 %789  ;;  %1682 = vrcp.f32 %v911_v30  ;;  %v921_v42 = vpop.permute.xlu1 %920 }
 0x5c1   : > { %1473 = vmatpush3.bf16.msra.mxu1 %v790_v36  ;;  %1684 = vrcp.f32 %v1042_v32 }
 0x5c2   : > { %1484 = vmatprep.subr.bf16.mxu1 %v1889_v1  ;;  %1686 = vrcp.f32 %v1045_v33 }
 0x5c4   : > { %v1052_v49 = vpop.permute.xlu1 %1051 }
 0x5c7   : > { %v1677_v37 = vpop.eup %1676 }
 0x5c8   : > { %v1679_v38 = vpop.eup %1678  ;;  %v785_v39 = vmul.f32 %v1677_v37, %v1673_v24 }
 0x5c9   : > { %v786_v40 = vmul.f32 %v1679_v38, %v1675_v27  ;;  %v1681_v41 = vpop.eup %1680 }
 0x5ca   : > { %v1683_v43 = vpop.eup %1682  ;;  %v918_v44 = vmul.f32 %v1681_v41, %v1667_v20 }
 0x5cb   : > { %v787_v53 = vpack.c.bf16 %v786_v40, %v785_v39  ;;  %v917_v45 = vmul.f32 %v1683_v43, %v1665_v18  ;;  %v1685_v46 = vpop.eup %1684 }
 0x5cc   : > { %v1687_v48 = vpop.eup %1686  ;;  %v1048_v50 = vmul.f32 %v1685_v46, %v1671_v23 }
 0x5cd   : > { %1475 = vmatmul.mubr.msk.bf16.vlgmr.msra.gmra.mrb[16].mxu1 %vm639_vm3, %v787_v53  ;;  %v919_v47 = vpack.c.bf16 %v918_v44, %v917_v45  ;;  %v1049_v51 = vmul.f32 %v1687_v48, %v1669_v22 }
 0x5ce   : > { %1485 = vmatpush3.bf16.msra.mxu1 %v921_v42  ;;  %1486 = vmatprep.mubr.msk.bf16.mxu1 %vm1890_vm1, %v1889_v1 }
 0x5cf   : > { %1496 = vmatprep.subr.bf16.mxu1 %v1889_v1  ;;  %v1050_v52 = vpack.c.bf16 %v1049_v51, %v1048_v50 }
 0x5d5   : > { %1487 = vmatmul.mubr.msk.bf16.vlgmr.msra.gmra.mrb[20].mxu1 %vm639_vm3, %v919_v47 }
 0x5d6   : > { %1497 = vmatpush3.bf16.msra.mxu1 %v1052_v49  ;;  %1498 = vmatprep.mubr.msk.bf16.mxu1 %vm1890_vm1, %v1889_v1 }
 0x5dd   : > { %1499 = vmatmul.mubr.msk.bf16.vlgmr.msra.gmra.mrb[24].mxu1 %vm639_vm3, %v1050_v52 }
 0x6a0   : > { %v829_v58 = vpop.f32.mrb[16].mxu1 }
 0x6a1   : > { %v1476_v60 = vpop.f32.mrb[17].mxu1 }
 0x6a2   : > { %v832_v61 = vpop.f32.mrb[18].mxu1 }
 0x6a3   : > { %v836_v63 = vpack.c.bf16 %v832_v61, %v829_v58  ;;  %v1477_v0 = vpop.f32.mrb[19].mxu1 }
 0x6a5   : > { %838 = vrot.lane.b32.xlu1 %v836_v63, %s1894_s20 }
 0x6a8   : > { %v960_v2 = vpop.f32.mrb[20].mxu1 }
 0x6a9   : > { %v1488_v4 = vpop.f32.mrb[21].mxu1 }
 0x6aa   : > { %v963_v5 = vpop.f32.mrb[22].mxu1 }
 0x6ab   : > { %v967_v7 = vpack.c.bf16 %v963_v5, %v960_v2  ;;  %v1489_v8 = vpop.f32.mrb[23].mxu1 }
 0x6ad   : > { %969 = vrot.lane.b32.xlu0 %v967_v7, %s1895_s26  ;;  %s1806_s26 = sshll.u32 %s1897_s25, 4  ;;  %s1807_s26 = int_to_ptr.vmem [resolvable:$false] %s1806_s26 }
 0x6ae   : > { %p1809_p12 = scmp.lt.s32.totalorder %s2246_s10, %s1807_s26 }
 0x6b0   : > { %v1091_v9 = vpop.f32.mrb[24].mxu1 }
 0x6b1   : > { %v1500_v10 = vpop.f32.mrb[25].mxu1 }
 0x6b2   : > { %v1094_v11 = vpop.f32.mrb[26].mxu1 }
 0x6b3   : > { %v1098_v12 = vpack.c.bf16 %v1094_v11, %v1091_v9  ;;  %v1501_v13 = vpop.f32.mrb[27].mxu1 }
 0x6b5   : > { %1100 = vrot.lane.b32.xlu1 %v1098_v12, %s1896_s9  ;;  %s1808_s9 = scalar_lea.vmem %s1807_s26, 512 }
 0x6b6   : > { %p1810_p2 = scmp.lt.s32.totalorder %s1808_s9, %s1802_s7 }
 0x6b8   : > { %p1811_p1 = por %p1810_p2, %p1809_p12 }
 0x6ba   : > { %p1812_p4 = pnand %p1811_p1, %p1805_p7 }
 0x717   : > { %v839_v14 = vpop.permute.xlu1 %838 }
 0x718   : > { %842 = vst.msk [vmem:[#allocation2] sm:$0xff] %vm841_vm4, %v839_v14 }
 0x71f   : > { %v970_v15 = vpop.permute.xlu0 %969 }
 0x720   : > { %973 = vst.msk [vmem:[#allocation2] sm:$0xff] %vm972_vm5, %v970_v15 }
 0x727   : > { %v1101_v1 = vpop.permute.xlu1 %1100 }
 0x728   : > { %1104 = vst.msk [vmem:[#allocation2] sm:$0xff] %vm1103_vm6, %v1101_v1 }
 0x72f   : > { %v1105_v16 = vld [vmem:[#allocation2] sm:$0xff] }
 0x730   : > { %1519 = vmatmul.mubr.bf16.vlgmr.msra.gmra.mrb[12].mxu0 %v1105_v16 }
 0x803   : > { %v1211_v18 = vpop.f32.mrb[12].mxu0 }
 0x804   : > { %v1212_v19 = vadd.f32 %v1384_v17, %v1211_v18  ;;  %v1520_v20 = vpop.f32.mrb[13].mxu0 }
 0x805   : > { %v1214_v21 = vpop.f32.mrb[14].mxu0 }
 0x806   : > { %1218 = vst [vmem:[%s313_s17] sm:$0xff] %v1212_v19  ;;  %v1215_v22 = vadd.f32 %v1384_v17, %v1214_v21  ;;  %v1521_v23 = vpop.f32.mrb[15].mxu0 }
 0x808   : > { %1219 = vst [vmem:[%s313_s17 + $0x8] sm:$0xff] %v1215_v22 }
 0x809   : > { %1815 = shalt.err (!%p1812_p4)
}
 0x80a   : > { %s1816_s15 = scalar_lea.hbm %s2251_s19, 256  ;;  %s1820_s17 = scalar_lea.hbm %s2302_s6, 512 }
 0x80b   : > { %p1817_p9 = scmp.ne.s32.totalorder %s2251_s19, %s1816_s15  ;;  %p1821_p8 = scmp.lt.u32.totalorder %s2251_s19, %s2302_s6 }
 0x80c   : > { %p1822_p13 = scmp.lt.u32.totalorder %s1820_s17, %s1816_s15  ;;  %p1824_p10 = scmp.lt.u32.totalorder %s1816_s15, %s2251_s19 }
 0x80d   : > { %p1818_p0 = pnand %p1817_p9, %p2079_p5 }
 0x80e   : > { %p1823_p6 = por %p1822_p13, %p1821_p8 }
 0x80f   : > { %p1819_p11 = pneg %p1818_p0 }
 0x810   : > { %p1825_p3 = por %p1824_p10, %p1823_p6 }
 0x812   : > { %p1826_p7 = pnand %p1825_p3, %p1819_p11 }
 0x814   : > { %1829 = shalt.err (!%p1826_p7)
}
 0x815   : > { %s1898_s29 = smov 128  }
 0x816   : > { %1536 = dma.vmem_to_hbm [thread:$0]  (%p2079_p5), %s2246_s10, 256, %s2251_s19, %s1221_s16, %s1898_s29, %s1898_s29, %s1894_s20  }
 0x817 PF: > { %s1249_s7 = sand.u32 1, %s1864_s21   ;;  %p2320_p12 = scmp.ne.s32.totalorder %s2307_s28, 0 }
 0x818   : > { %p2321_p2 = scmp.ge.s32.totalorder %s1876_s24, 2  ;;  %s1250_s25 = scalar_lea.sflag [#allocation5], %s1249_s7 }
 0x81a   : > { %p1553_p1 = pnand %p2321_p2, %p2320_p12 }
 0x81c   : > { %1859 = dma.done.wait (!%p1553_p1), %s1250_s25, 256  }
 0x81d   : > { %1861 = vsyncadd (!%p1553_p1), %s1250_s25, 4294967040  ;;  %p21_p4 = scmp.ge.s32.totalorder %s2065_s30, 4   ;;  %s2322_s21 = smov %s1868_s22 }
 0x81e   : > { %s2323_s22 = smov %s1872_s23  ;;  %s2324_s23 = smov %s2075_s13 }
 0x81f   : > { %s2325_s24 = smov %s2065_s30  ;;  %23 = sbr.rel (!%p21_p4) target bundleno = 7 (0x7), region = 104 }
 0x826   :  { %1255 = vsyncpa [#allocation4], 1 }
 0x827   :  { %1257 = vsyncpa [#allocation4 + $0x1], 1 }
 0x828   :  { %1258 = vsyncpa [#allocation7], 1 }
 0x829   :  { %1259 = vsyncpa [#allocation10], 1 }
 0x82a   :  { %1260 = vsyncpa [#allocation5], 1 }
 0x82b   :  { %1262 = vsyncpa [#allocation5 + $0x1], 1 }

</bundles_post_ra>
